<compile_context>
chip_gen: v7x
topology: tpu7x:2x2x1
jax: 0.10.0
libtpu: 0.0.40
codegen_flags: <defaults>
</compile_context>

<pallas_src>
import jax
import jax.numpy as jnp
import numpy as np
from jax.experimental import pallas as pl
from jax.experimental.pallas import tpu as pltpu

LEAKY_SLOPE = 0.01   # nn.LeakyReLU default
BN_EPS = 1e-5        # nn.BatchNorm2d default


# ------------------------------ fused kernel -------------------------------- #

def _make_fused_kernel(L, cmax, NHW, W, cout_f):
    """Fused (Conv3x3 + LeakyReLU + BatchNorm2d) x L forward.

    Refs: x (cmax, NHW), mask (9, NHW), w (L, 9, cmax, cmax) with w[l,t] = tap-t
    weight (cout, cin) zero-padded, p (L, cmax, 8) = [bias, gamma, beta, 0...],
    out (cout_f, NHW).
    """
    inv_cnt = 1.0 / NHW   # BN count = N*H*W (batch fused on the lane axis)

    def kernel(x_ref, mask_ref, w_ref, p_ref, o_ref):
        h = x_ref[...]                                          # (cmax, NHW) f32

        for li in range(L):
            # ---- Conv2d(3x3, stride 1, pad 1): 9 accumulated per-tap matmuls
            acc = None
            for tap in range(9):
                dy, dx = tap // 3 - 1, tap % 3 - 1
                d = dy * W + dx                                  # lane shift of this tap
                if d == 0:
                    xt = h
                else:
                    # roll == np.roll semantics; wrapped / out-of-image lanes are
                    # exactly the ones the boundary mask zeroes.
                    xt = pltpu.roll(h, (-d) % NHW, 1) * mask_ref[tap:tap + 1, :]
                part = jnp.dot(w_ref[li, tap], xt,
                               preferred_element_type=jnp.float32)
                acc = part if acc is None else acc + part        # (cmax, NHW)

            pv = p_ref[li]                                       # (cmax, 8)
            y = acc + pv[:, 0:1]                                 # conv bias
            y = jnp.maximum(y, LEAKY_SLOPE * y)                  # LeakyReLU(0.01)

            # ---- BatchNorm2d, training-mode batch stats, single pass --------
            s1 = jnp.sum(y, axis=1, keepdims=True)               # (cmax, 1)
            s2 = jnp.sum(y * y, axis=1, keepdims=True)
            mean = s1 * inv_cnt
            var = jnp.maximum(s2 * inv_cnt - mean * mean, 0.0)   # biased variance
            scale = jax.lax.rsqrt(var + BN_EPS) * pv[:, 1:2]     # gamma folded in
            shift = pv[:, 2:3] - mean * scale                    # beta - mean*scale
            h = y * scale + shift

        o_ref[...] = h[:cout_f].astype(o_ref.dtype)

    return kernel


# ------------------------------ module forward ------------------------------ #

def _whole_spec(shape):
    nd = len(shape)
    return pl.BlockSpec(shape, lambda i, _nd=nd: (0,) * _nd)


def _packed_tap_mask(N, H, W):
    """(9, N*H*W) f32 validity mask per 3x3 tap.

    Kills every lane whose source position crosses a row / column / image
    boundary, so lane rolls on the fused N*HW axis cannot leak between images."""
    q = np.arange(H * W)
    yy, xx = q // W, q % W
    rows = []
    for tap in range(9):
        dy, dx = tap // 3 - 1, tap % 3 - 1
        m = (yy + dy >= 0) & (yy + dy < H) & (xx + dx >= 0) & (xx + dx < W)
        rows.append(m.astype(np.float32))
    return np.tile(np.stack(rows, 0), (1, N))                    # (9, N*HW)


def spatial_attention_block_presum(t_flex_pool, t_flex_conv, params):
    """Forward of SpatialAttentionBlockPreSum. NCHW in / NCHW out.

    The whole stack of (Conv3x3 -> LeakyReLU -> BatchNorm2d) layers runs in a
    single pallas_call; the wrapper only does the pre-sum and layout plumbing."""
    N, C, H, W = t_flex_pool.shape
    HW, NHW = H * W, N * H * W
    L = len(params)

    dims = [(w.shape[2], w.shape[3]) for (w, _, _, _) in params]  # HWIO: (cin, cout)
    cout_f = dims[-1][1]
    cmax = max(8, -(-max(max(ci, co) for ci, co in dims) // 8) * 8)

    # Pre-sum (combined_logits) + channel-major layout, images fused on lanes.
    x = (t_flex_pool + t_flex_conv).astype(jnp.float32)
    x = x.reshape(N, C, HW).transpose(1, 0, 2).reshape(C, NHW)
    x = jnp.pad(x, ((0, cmax - C), (0, 0)))

    # Pack all layers' weights / per-channel params into two operands.
    w_l, p_l = [], []
    for (w, b, g, bt) in params:
        _, _, cin, cout = w.shape
        wt = jnp.transpose(w.reshape(9, cin, cout), (0, 2, 1))    # (9, cout, cin)
        w_l.append(jnp.pad(wt, ((0, 0), (0, cmax - cout), (0, cmax - cin))))
        pv = jnp.stack([b, g, bt], axis=1)                        # (cout, 3)
        p_l.append(jnp.pad(pv, ((0, cmax - cout), (0, 8 - 3))))
    wall = jnp.stack(w_l, 0)                                      # (L, 9, cmax, cmax)
    pvals = jnp.stack(p_l, 0)                                     # (L, cmax, 8)
    mask = _packed_tap_mask(N, H, W)                              # (9, NHW), constant

    out = pl.pallas_call(
        _make_fused_kernel(L, cmax, NHW, W, cout_f),
        out_shape=jax.ShapeDtypeStruct((cout_f, NHW), jnp.float32),
        grid=(1,),
        in_specs=[_whole_spec((cmax, NHW)),
                  _whole_spec((9, NHW)),
                  _whole_spec((L, 9, cmax, cmax)),
                  _whole_spec((L, cmax, 8))],
        out_specs=_whole_spec((cout_f, NHW)),
        compiler_params=pltpu.CompilerParams(
            dimension_semantics=("arbitrary",)),
    )(x, mask, wall, pvals)

    return out.reshape(cout_f, N, HW).transpose(1, 0, 2).reshape(N, cout_f, H, W)


# ------------------------------ parameters ---------------------------------- #

def init_params(key, num_blocks, in_channels, out_channels):
    """Deterministic synthetic params. One tuple per (Conv, LeakyReLU, BN) group."""
    cins = [in_channels] * num_blocks + [in_channels]
    couts = [in_channels] * num_blocks + [out_channels]
    params = []
    for cin, cout in zip(cins, couts):
        key, kw, kb, kg, kbt = jax.random.split(key, 5)
        w = 0.1 * jax.random.normal(kw, (3, 3, cin, cout), jnp.float32)   # HWIO
        b = 0.1 * jax.random.normal(kb, (cout,), jnp.float32)
        g = 1.0 + 0.1 * jax.random.normal(kg, (cout,), jnp.float32)       # BN weight
        bt = 0.1 * jax.random.normal(kbt, (cout,), jnp.float32)           # BN bias
        params.append((w, b, g, bt))
    return params


# --------------------------- pure-JAX reference ----------------------------- #

def reference_forward(t_flex_pool, t_flex_conv, params):
    x = jnp.transpose(t_flex_pool + t_flex_conv, (0, 2, 3, 1))
    for (w, b, g, bt) in params:
        y = jax.lax.conv_general_dilated(
            x, w, window_strides=(1, 1), padding="SAME",
            dimension_numbers=("NHWC", "HWIO", "NHWC"),
            precision=jax.lax.Precision.HIGHEST) + b[None, None, None, :]
        y = jnp.where(y > 0.0, y, LEAKY_SLOPE * y)
        m = jnp.mean(y, axis=(0, 1, 2), keepdims=True)
        v = jnp.mean(jnp.square(y - m), axis=(0, 1, 2), keepdims=True)
        x = (y - m) * jax.lax.rsqrt(v + BN_EPS) * g + bt
    return jnp.transpose(x, (0, 3, 1, 2))


# ----------------------------------- main ----------------------------------- #

if __name__ == "__main__":
    num_blocks, in_ch, out_ch = 2, 4, 8
    N, H, W = 2, 16, 16

    key = jax.random.PRNGKey(0)
    k_pool, k_conv, k_params = jax.random.split(key, 3)
    t_flex_pool = jax.random.normal(k_pool, (N, in_ch, H, W), jnp.float32)
    t_flex_conv = jax.random.normal(k_conv, (N, in_ch, H, W), jnp.float32)
    params = init_params(k_params, num_blocks, in_ch, out_ch)

    fwd = jax.jit(spatial_attention_block_presum)
    out = jax.block_until_ready(fwd(t_flex_pool, t_flex_conv, params))

    assert out.shape == (N, out_ch, H, W), out.shape
    assert out.dtype == jnp.float32, out.dtype

    ref = reference_forward(t_flex_pool, t_flex_conv, params)
    max_err = float(jnp.max(jnp.abs(out - ref)))
    assert bool(jnp.allclose(out, ref, atol=2e-2, rtol=2e-2)), max_err

    print("KERNEL_OK")
</pallas_src>

<mosaic_0001>
module attributes {stable_mosaic.version = 11 : i64} {
  func.func @kernel(%arg0: i32, %arg1: memref<8x512xf32, #tpu.memory_space<vmem>>, %arg2: memref<9x512xf32, #tpu.memory_space<vmem>>, %arg3: memref<3x9x8x8xf32, #tpu.memory_space<vmem>>, %arg4: memref<3x8x8xf32, #tpu.memory_space<vmem>>, %arg5: memref<8x512xf32, #tpu.memory_space<vmem>>) attributes {dimension_semantics = [#tpu.dimension_semantics<arbitrary>], iteration_bounds = array<i64: 1>, scalar_prefetch = 0 : i64, scratch_operands = 0 : i64, tpu.core_type = #tpu.core_type<tc>, window_params = [{pipeline_mode = #tpu.pipeline_mode<synchronous>, transform_indices = @transform_0, window_bounds = array<i64: 8, 512>}, {pipeline_mode = #tpu.pipeline_mode<synchronous>, transform_indices = @transform_1, window_bounds = array<i64: 9, 512>}, {pipeline_mode = #tpu.pipeline_mode<synchronous>, transform_indices = @transform_2, window_bounds = array<i64: 3, 9, 8, 8>}, {pipeline_mode = #tpu.pipeline_mode<synchronous>, transform_indices = @transform_3, window_bounds = array<i64: 3, 8, 8>}, {pipeline_mode = #tpu.pipeline_mode<synchronous>, transform_indices = @transform_4, window_bounds = array<i64: 8, 512>}]} {
    %c0 = arith.constant 0 : index
    %c0_0 = arith.constant 0 : index
    %0 = vector.load %arg1[%c0, %c0_0] : memref<8x512xf32, #tpu.memory_space<vmem>>, vector<8x512xf32>
    %c17_i32 = arith.constant 17 : i32
    %1 = tpu.dynamic_rotate %0 by %c17_i32 dim 1 : vector<8x512xf32>, i32 -> vector<8x512xf32>
    %c0_1 = arith.constant 0 : index
    %c0_2 = arith.constant 0 : index
    %2 = vector.load %arg2[%c0_1, %c0_2] : memref<9x512xf32, #tpu.memory_space<vmem>>, vector<1x512xf32>
    %3 = vector.broadcast %2 : vector<1x512xf32> to vector<8x512xf32>
    %4 = arith.mulf %1, %3 : vector<8x512xf32>
    %c0_3 = arith.constant 0 : index
    %c0_4 = arith.constant 0 : index
    %c0_5 = arith.constant 0 : index
    %c0_6 = arith.constant 0 : index
    %5 = vector.load %arg3[%c0_3, %c0_4, %c0_5, %c0_6] : memref<3x9x8x8xf32, #tpu.memory_space<vmem>>, vector<1x1x8x8xf32>
    %6 = vector.shape_cast %5 : vector<1x1x8x8xf32> to vector<8x8xf32>
    %cst = arith.constant dense<0.000000e+00> : vector<8x512xf32>
    %7 = tpu.matmul %6, %4, %cst {dimension_numbers = #tpu.dot_dimension_numbers<[1], [0], [0], [1], [0, 0, 1, 1], [], []>} : vector<8x8xf32>, vector<8x512xf32>, vector<8x512xf32> -> vector<8x512xf32>
    %c16_i32 = arith.constant 16 : i32
    %8 = tpu.dynamic_rotate %0 by %c16_i32 dim 1 : vector<8x512xf32>, i32 -> vector<8x512xf32>
    %c1 = arith.constant 1 : index
    %c0_7 = arith.constant 0 : index
    %9 = vector.load %arg2[%c1, %c0_7] : memref<9x512xf32, #tpu.memory_space<vmem>>, vector<1x512xf32>
    %10 = vector.broadcast %9 : vector<1x512xf32> to vector<8x512xf32>
    %11 = arith.mulf %8, %10 : vector<8x512xf32>
    %c0_8 = arith.constant 0 : index
    %c1_9 = arith.constant 1 : index
    %c0_10 = arith.constant 0 : index
    %c0_11 = arith.constant 0 : index
    %12 = vector.load %arg3[%c0_8, %c1_9, %c0_10, %c0_11] : memref<3x9x8x8xf32, #tpu.memory_space<vmem>>, vector<1x1x8x8xf32>
    %13 = vector.shape_cast %12 : vector<1x1x8x8xf32> to vector<8x8xf32>
    %cst_12 = arith.constant dense<0.000000e+00> : vector<8x512xf32>
    %14 = tpu.matmul %13, %11, %cst_12 {dimension_numbers = #tpu.dot_dimension_numbers<[1], [0], [0], [1], [0, 0, 1, 1], [], []>} : vector<8x8xf32>, vector<8x512xf32>, vector<8x512xf32> -> vector<8x512xf32>
    %15 = arith.addf %7, %14 : vector<8x512xf32>
    %c15_i32 = arith.constant 15 : i32
    %16 = tpu.dynamic_rotate %0 by %c15_i32 dim 1 : vector<8x512xf32>, i32 -> vector<8x512xf32>
    %c2 = arith.constant 2 : index
    %c0_13 = arith.constant 0 : index
    %17 = vector.load %arg2[%c2, %c0_13] : memref<9x512xf32, #tpu.memory_space<vmem>>, vector<1x512xf32>
    %18 = vector.broadcast %17 : vector<1x512xf32> to vector<8x512xf32>
    %19 = arith.mulf %16, %18 : vector<8x512xf32>
    %c0_14 = arith.constant 0 : index
    %c2_15 = arith.constant 2 : index
    %c0_16 = arith.constant 0 : index
    %c0_17 = arith.constant 0 : index
    %20 = vector.load %arg3[%c0_14, %c2_15, %c0_16, %c0_17] : memref<3x9x8x8xf32, #tpu.memory_space<vmem>>, vector<1x1x8x8xf32>
    %21 = vector.shape_cast %20 : vector<1x1x8x8xf32> to vector<8x8xf32>
    %cst_18 = arith.constant dense<0.000000e+00> : vector<8x512xf32>
    %22 = tpu.matmul %21, %19, %cst_18 {dimension_numbers = #tpu.dot_dimension_numbers<[1], [0], [0], [1], [0, 0, 1, 1], [], []>} : vector<8x8xf32>, vector<8x512xf32>, vector<8x512xf32> -> vector<8x512xf32>
    %23 = arith.addf %15, %22 : vector<8x512xf32>
    %c1_i32 = arith.constant 1 : i32
    %24 = tpu.dynamic_rotate %0 by %c1_i32 dim 1 : vector<8x512xf32>, i32 -> vector<8x512xf32>
    %c3 = arith.constant 3 : index
    %c0_19 = arith.constant 0 : index
    %25 = vector.load %arg2[%c3, %c0_19] : memref<9x512xf32, #tpu.memory_space<vmem>>, vector<1x512xf32>
    %26 = vector.broadcast %25 : vector<1x512xf32> to vector<8x512xf32>
    %27 = arith.mulf %24, %26 : vector<8x512xf32>
    %c0_20 = arith.constant 0 : index
    %c3_21 = arith.constant 3 : index
    %c0_22 = arith.constant 0 : index
    %c0_23 = arith.constant 0 : index
    %28 = vector.load %arg3[%c0_20, %c3_21, %c0_22, %c0_23] : memref<3x9x8x8xf32, #tpu.memory_space<vmem>>, vector<1x1x8x8xf32>
    %29 = vector.shape_cast %28 : vector<1x1x8x8xf32> to vector<8x8xf32>
    %cst_24 = arith.constant dense<0.000000e+00> : vector<8x512xf32>
    %30 = tpu.matmul %29, %27, %cst_24 {dimension_numbers = #tpu.dot_dimension_numbers<[1], [0], [0], [1], [0, 0, 1, 1], [], []>} : vector<8x8xf32>, vector<8x512xf32>, vector<8x512xf32> -> vector<8x512xf32>
    %31 = arith.addf %23, %30 : vector<8x512xf32>
    %c0_25 = arith.constant 0 : index
    %c4 = arith.constant 4 : index
    %c0_26 = arith.constant 0 : index
    %c0_27 = arith.constant 0 : index
    %32 = vector.load %arg3[%c0_25, %c4, %c0_26, %c0_27] : memref<3x9x8x8xf32, #tpu.memory_space<vmem>>, vector<1x1x8x8xf32>
    %33 = vector.shape_cast %32 : vector<1x1x8x8xf32> to vector<8x8xf32>
    %cst_28 = arith.constant dense<0.000000e+00> : vector<8x512xf32>
    %34 = tpu.matmul %33, %0, %cst_28 {dimension_numbers = #tpu.dot_dimension_numbers<[1], [0], [0], [1], [0, 0, 1, 1], [], []>} : vector<8x8xf32>, vector<8x512xf32>, vector<8x512xf32> -> vector<8x512xf32>
    %35 = arith.addf %31, %34 : vector<8x512xf32>
    %c511_i32 = arith.constant 511 : i32
    %36 = tpu.dynamic_rotate %0 by %c511_i32 dim 1 : vector<8x512xf32>, i32 -> vector<8x512xf32>
    %c5 = arith.constant 5 : index
    %c0_29 = arith.constant 0 : index
    %37 = vector.load %arg2[%c5, %c0_29] : memref<9x512xf32, #tpu.memory_space<vmem>>, vector<1x512xf32>
    %38 = vector.broadcast %37 : vector<1x512xf32> to vector<8x512xf32>
    %39 = arith.mulf %36, %38 : vector<8x512xf32>
    %c0_30 = arith.constant 0 : index
    %c5_31 = arith.constant 5 : index
    %c0_32 = arith.constant 0 : index
    %c0_33 = arith.constant 0 : index
    %40 = vector.load %arg3[%c0_30, %c5_31, %c0_32, %c0_33] : memref<3x9x8x8xf32, #tpu.memory_space<vmem>>, vector<1x1x8x8xf32>
    %41 = vector.shape_cast %40 : vector<1x1x8x8xf32> to vector<8x8xf32>
    %cst_34 = arith.constant dense<0.000000e+00> : vector<8x512xf32>
    %42 = tpu.matmul %41, %39, %cst_34 {dimension_numbers = #tpu.dot_dimension_numbers<[1], [0], [0], [1], [0, 0, 1, 1], [], []>} : vector<8x8xf32>, vector<8x512xf32>, vector<8x512xf32> -> vector<8x512xf32>
    %43 = arith.addf %35, %42 : vector<8x512xf32>
    %c497_i32 = arith.constant 497 : i32
    %44 = tpu.dynamic_rotate %0 by %c497_i32 dim 1 : vector<8x512xf32>, i32 -> vector<8x512xf32>
    %c6 = arith.constant 6 : index
    %c0_35 = arith.constant 0 : index
    %45 = vector.load %arg2[%c6, %c0_35] : memref<9x512xf32, #tpu.memory_space<vmem>>, vector<1x512xf32>
    %46 = vector.broadcast %45 : vector<1x512xf32> to vector<8x512xf32>
    %47 = arith.mulf %44, %46 : vector<8x512xf32>
    %c0_36 = arith.constant 0 : index
    %c6_37 = arith.constant 6 : index
    %c0_38 = arith.constant 0 : index
    %c0_39 = arith.constant 0 : index
    %48 = vector.load %arg3[%c0_36, %c6_37, %c0_38, %c0_39] : memref<3x9x8x8xf32, #tpu.memory_space<vmem>>, vector<1x1x8x8xf32>
    %49 = vector.shape_cast %48 : vector<1x1x8x8xf32> to vector<8x8xf32>
    %cst_40 = arith.constant dense<0.000000e+00> : vector<8x512xf32>
    %50 = tpu.matmul %49, %47, %cst_40 {dimension_numbers = #tpu.dot_dimension_numbers<[1], [0], [0], [1], [0, 0, 1, 1], [], []>} : vector<8x8xf32>, vector<8x512xf32>, vector<8x512xf32> -> vector<8x512xf32>
    %51 = arith.addf %43, %50 : vector<8x512xf32>
    %c496_i32 = arith.constant 496 : i32
    %52 = tpu.dynamic_rotate %0 by %c496_i32 dim 1 : vector<8x512xf32>, i32 -> vector<8x512xf32>
    %c7 = arith.constant 7 : index
    %c0_41 = arith.constant 0 : index
    %53 = vector.load %arg2[%c7, %c0_41] : memref<9x512xf32, #tpu.memory_space<vmem>>, vector<1x512xf32>
    %54 = vector.broadcast %53 : vector<1x512xf32> to vector<8x512xf32>
    %55 = arith.mulf %52, %54 : vector<8x512xf32>
    %c0_42 = arith.constant 0 : index
    %c7_43 = arith.constant 7 : index
    %c0_44 = arith.constant 0 : index
    %c0_45 = arith.constant 0 : index
    %56 = vector.load %arg3[%c0_42, %c7_43, %c0_44, %c0_45] : memref<3x9x8x8xf32, #tpu.memory_space<vmem>>, vector<1x1x8x8xf32>
    %57 = vector.shape_cast %56 : vector<1x1x8x8xf32> to vector<8x8xf32>
    %cst_46 = arith.constant dense<0.000000e+00> : vector<8x512xf32>
    %58 = tpu.matmul %57, %55, %cst_46 {dimension_numbers = #tpu.dot_dimension_numbers<[1], [0], [0], [1], [0, 0, 1, 1], [], []>} : vector<8x8xf32>, vector<8x512xf32>, vector<8x512xf32> -> vector<8x512xf32>
    %59 = arith.addf %51, %58 : vector<8x512xf32>
    %c495_i32 = arith.constant 495 : i32
    %60 = tpu.dynamic_rotate %0 by %c495_i32 dim 1 : vector<8x512xf32>, i32 -> vector<8x512xf32>
    %c8 = arith.constant 8 : index
    %c0_47 = arith.constant 0 : index
    %61 = vector.load %arg2[%c8, %c0_47] : memref<9x512xf32, #tpu.memory_space<vmem>>, vector<1x512xf32>
    %62 = vector.broadcast %61 : vector<1x512xf32> to vector<8x512xf32>
    %63 = arith.mulf %60, %62 : vector<8x512xf32>
    %c0_48 = arith.constant 0 : index
    %c8_49 = arith.constant 8 : index
    %c0_50 = arith.constant 0 : index
    %c0_51 = arith.constant 0 : index
    %64 = vector.load %arg3[%c0_48, %c8_49, %c0_50, %c0_51] : memref<3x9x8x8xf32, #tpu.memory_space<vmem>>, vector<1x1x8x8xf32>
    %65 = vector.shape_cast %64 : vector<1x1x8x8xf32> to vector<8x8xf32>
    %cst_52 = arith.constant dense<0.000000e+00> : vector<8x512xf32>
    %66 = tpu.matmul %65, %63, %cst_52 {dimension_numbers = #tpu.dot_dimension_numbers<[1], [0], [0], [1], [0, 0, 1, 1], [], []>} : vector<8x8xf32>, vector<8x512xf32>, vector<8x512xf32> -> vector<8x512xf32>
    %67 = arith.addf %59, %66 : vector<8x512xf32>
    %c0_53 = arith.constant 0 : index
    %c0_54 = arith.constant 0 : index
    %c0_55 = arith.constant 0 : index
    %68 = vector.load %arg4[%c0_53, %c0_54, %c0_55] : memref<3x8x8xf32, #tpu.memory_space<vmem>>, vector<1x8x8xf32>
    %69 = vector.shape_cast %68 : vector<1x8x8xf32> to vector<8x8xf32>
    %70 = vector.extract_strided_slice %69 {offsets = [0, 0], sizes = [8, 1], strides = [1, 1]} : vector<8x8xf32> to vector<8x1xf32>
    %71 = vector.broadcast %70 : vector<8x1xf32> to vector<8x512xf32>
    %72 = arith.addf %67, %71 : vector<8x512xf32>
    %cst_56 = arith.constant 0.00999999977 : f32
    %73 = vector.broadcast %cst_56 : f32 to vector<8x512xf32>
    %74 = arith.mulf %73, %72 : vector<8x512xf32>
    %75 = arith.maximumf %72, %74 : vector<8x512xf32>
    %cst_57 = arith.constant dense<0.000000e+00> : vector<8xf32>
    %76 = vector.multi_reduction <add>, %75, %cst_57 [1] : vector<8x512xf32> to vector<8xf32>
    %77 = vector.shape_cast %76 : vector<8xf32> to vector<8x1xf32>
    %78 = arith.mulf %75, %75 : vector<8x512xf32>
    %cst_58 = arith.constant dense<0.000000e+00> : vector<8xf32>
    %79 = vector.multi_reduction <add>, %78, %cst_58 [1] : vector<8x512xf32> to vector<8xf32>
    %80 = vector.shape_cast %79 : vector<8xf32> to vector<8x1xf32>
    %cst_59 = arith.constant 0.001953125 : f32
    %81 = vector.broadcast %cst_59 : f32 to vector<8x1xf32>
    %82 = arith.mulf %77, %81 : vector<8x1xf32>
    %cst_60 = arith.constant 0.001953125 : f32
    %83 = vector.broadcast %cst_60 : f32 to vector<8x1xf32>
    %84 = arith.mulf %80, %83 : vector<8x1xf32>
    %85 = arith.mulf %82, %82 : vector<8x1xf32>
    %86 = arith.subf %84, %85 : vector<8x1xf32>
    %cst_61 = arith.constant 0.000000e+00 : f32
    %87 = vector.broadcast %cst_61 : f32 to vector<8x1xf32>
    %88 = arith.maximumf %86, %87 : vector<8x1xf32>
    %cst_62 = arith.constant 9.99999974E-6 : f32
    %89 = vector.broadcast %cst_62 : f32 to vector<8x1xf32>
    %90 = arith.addf %88, %89 : vector<8x1xf32>
    %91 = math.rsqrt %90 : vector<8x1xf32>
    %92 = vector.extract_strided_slice %69 {offsets = [0, 1], sizes = [8, 1], strides = [1, 1]} : vector<8x8xf32> to vector<8x1xf32>
    %93 = arith.mulf %91, %92 : vector<8x1xf32>
    %94 = vector.extract_strided_slice %69 {offsets = [0, 2], sizes = [8, 1], strides = [1, 1]} : vector<8x8xf32> to vector<8x1xf32>
    %95 = arith.mulf %82, %93 : vector<8x1xf32>
    %96 = arith.subf %94, %95 : vector<8x1xf32>
    %97 = vector.broadcast %93 : vector<8x1xf32> to vector<8x512xf32>
    %98 = arith.mulf %75, %97 : vector<8x512xf32>
    %99 = vector.broadcast %96 : vector<8x1xf32> to vector<8x512xf32>
    %100 = arith.addf %98, %99 : vector<8x512xf32>
    %c17_i32_63 = arith.constant 17 : i32
    %101 = tpu.dynamic_rotate %100 by %c17_i32_63 dim 1 : vector<8x512xf32>, i32 -> vector<8x512xf32>
    %c0_64 = arith.constant 0 : index
    %c0_65 = arith.constant 0 : index
    %102 = vector.load %arg2[%c0_64, %c0_65] : memref<9x512xf32, #tpu.memory_space<vmem>>, vector<1x512xf32>
    %103 = vector.broadcast %102 : vector<1x512xf32> to vector<8x512xf32>
    %104 = arith.mulf %101, %103 : vector<8x512xf32>
    %c1_66 = arith.constant 1 : index
    %c0_67 = arith.constant 0 : index
    %c0_68 = arith.constant 0 : index
    %c0_69 = arith.constant 0 : index
    %105 = vector.load %arg3[%c1_66, %c0_67, %c0_68, %c0_69] : memref<3x9x8x8xf32, #tpu.memory_space<vmem>>, vector<1x1x8x8xf32>
    %106 = vector.shape_cast %105 : vector<1x1x8x8xf32> to vector<8x8xf32>
    %cst_70 = arith.constant dense<0.000000e+00> : vector<8x512xf32>
    %107 = tpu.matmul %106, %104, %cst_70 {dimension_numbers = #tpu.dot_dimension_numbers<[1], [0], [0], [1], [0, 0, 1, 1], [], []>} : vector<8x8xf32>, vector<8x512xf32>, vector<8x512xf32> -> vector<8x512xf32>
    %c16_i32_71 = arith.constant 16 : i32
    %108 = tpu.dynamic_rotate %100 by %c16_i32_71 dim 1 : vector<8x512xf32>, i32 -> vector<8x512xf32>
    %c1_72 = arith.constant 1 : index
    %c0_73 = arith.constant 0 : index
    %109 = vector.load %arg2[%c1_72, %c0_73] : memref<9x512xf32, #tpu.memory_space<vmem>>, vector<1x512xf32>
    %110 = vector.broadcast %109 : vector<1x512xf32> to vector<8x512xf32>
    %111 = arith.mulf %108, %110 : vector<8x512xf32>
    %c1_74 = arith.constant 1 : index
    %c1_75 = arith.constant 1 : index
    %c0_76 = arith.constant 0 : index
    %c0_77 = arith.constant 0 : index
    %112 = vector.load %arg3[%c1_74, %c1_75, %c0_76, %c0_77] : memref<3x9x8x8xf32, #tpu.memory_space<vmem>>, vector<1x1x8x8xf32>
    %113 = vector.shape_cast %112 : vector<1x1x8x8xf32> to vector<8x8xf32>
    %cst_78 = arith.constant dense<0.000000e+00> : vector<8x512xf32>
    %114 = tpu.matmul %113, %111, %cst_78 {dimension_numbers = #tpu.dot_dimension_numbers<[1], [0], [0], [1], [0, 0, 1, 1], [], []>} : vector<8x8xf32>, vector<8x512xf32>, vector<8x512xf32> -> vector<8x512xf32>
    %115 = arith.addf %107, %114 : vector<8x512xf32>
    %c15_i32_79 = arith.constant 15 : i32
    %116 = tpu.dynamic_rotate %100 by %c15_i32_79 dim 1 : vector<8x512xf32>, i32 -> vector<8x512xf32>
    %c2_80 = arith.constant 2 : index
    %c0_81 = arith.constant 0 : index
    %117 = vector.load %arg2[%c2_80, %c0_81] : memref<9x512xf32, #tpu.memory_space<vmem>>, vector<1x512xf32>
    %118 = vector.broadcast %117 : vector<1x512xf32> to vector<8x512xf32>
    %119 = arith.mulf %116, %118 : vector<8x512xf32>
    %c1_82 = arith.constant 1 : index
    %c2_83 = arith.constant 2 : index
    %c0_84 = arith.constant 0 : index
    %c0_85 = arith.constant 0 : index
    %120 = vector.load %arg3[%c1_82, %c2_83, %c0_84, %c0_85] : memref<3x9x8x8xf32, #tpu.memory_space<vmem>>, vector<1x1x8x8xf32>
    %121 = vector.shape_cast %120 : vector<1x1x8x8xf32> to vector<8x8xf32>
    %cst_86 = arith.constant dense<0.000000e+00> : vector<8x512xf32>
    %122 = tpu.matmul %121, %119, %cst_86 {dimension_numbers = #tpu.dot_dimension_numbers<[1], [0], [0], [1], [0, 0, 1, 1], [], []>} : vector<8x8xf32>, vector<8x512xf32>, vector<8x512xf32> -> vector<8x512xf32>
    %123 = arith.addf %115, %122 : vector<8x512xf32>
    %c1_i32_87 = arith.constant 1 : i32
    %124 = tpu.dynamic_rotate %100 by %c1_i32_87 dim 1 : vector<8x512xf32>, i32 -> vector<8x512xf32>
    %c3_88 = arith.constant 3 : index
    %c0_89 = arith.constant 0 : index
    %125 = vector.load %arg2[%c3_88, %c0_89] : memref<9x512xf32, #tpu.memory_space<vmem>>, vector<1x512xf32>
    %126 = vector.broadcast %125 : vector<1x512xf32> to vector<8x512xf32>
    %127 = arith.mulf %124, %126 : vector<8x512xf32>
    %c1_90 = arith.constant 1 : index
    %c3_91 = arith.constant 3 : index
    %c0_92 = arith.constant 0 : index
    %c0_93 = arith.constant 0 : index
    %128 = vector.load %arg3[%c1_90, %c3_91, %c0_92, %c0_93] : memref<3x9x8x8xf32, #tpu.memory_space<vmem>>, vector<1x1x8x8xf32>
    %129 = vector.shape_cast %128 : vector<1x1x8x8xf32> to vector<8x8xf32>
    %cst_94 = arith.constant dense<0.000000e+00> : vector<8x512xf32>
    %130 = tpu.matmul %129, %127, %cst_94 {dimension_numbers = #tpu.dot_dimension_numbers<[1], [0], [0], [1], [0, 0, 1, 1], [], []>} : vector<8x8xf32>, vector<8x512xf32>, vector<8x512xf32> -> vector<8x512xf32>
    %131 = arith.addf %123, %130 : vector<8x512xf32>
    %c1_95 = arith.constant 1 : index
    %c4_96 = arith.constant 4 : index
    %c0_97 = arith.constant 0 : index
    %c0_98 = arith.constant 0 : index
    %132 = vector.load %arg3[%c1_95, %c4_96, %c0_97, %c0_98] : memref<3x9x8x8xf32, #tpu.memory_space<vmem>>, vector<1x1x8x8xf32>
    %133 = vector.shape_cast %132 : vector<1x1x8x8xf32> to vector<8x8xf32>
    %cst_99 = arith.constant dense<0.000000e+00> : vector<8x512xf32>
    %134 = tpu.matmul %133, %100, %cst_99 {dimension_numbers = #tpu.dot_dimension_numbers<[1], [0], [0], [1], [0, 0, 1, 1], [], []>} : vector<8x8xf32>, vector<8x512xf32>, vector<8x512xf32> -> vector<8x512xf32>
    %135 = arith.addf %131, %134 : vector<8x512xf32>
    %c511_i32_100 = arith.constant 511 : i32
    %136 = tpu.dynamic_rotate %100 by %c511_i32_100 dim 1 : vector<8x512xf32>, i32 -> vector<8x512xf32>
    %c5_101 = arith.constant 5 : index
    %c0_102 = arith.constant 0 : index
    %137 = vector.load %arg2[%c5_101, %c0_102] : memref<9x512xf32, #tpu.memory_space<vmem>>, vector<1x512xf32>
    %138 = vector.broadcast %137 : vector<1x512xf32> to vector<8x512xf32>
    %139 = arith.mulf %136, %138 : vector<8x512xf32>
    %c1_103 = arith.constant 1 : index
    %c5_104 = arith.constant 5 : index
    %c0_105 = arith.constant 0 : index
    %c0_106 = arith.constant 0 : index
    %140 = vector.load %arg3[%c1_103, %c5_104, %c0_105, %c0_106] : memref<3x9x8x8xf32, #tpu.memory_space<vmem>>, vector<1x1x8x8xf32>
    %141 = vector.shape_cast %140 : vector<1x1x8x8xf32> to vector<8x8xf32>
    %cst_107 = arith.constant dense<0.000000e+00> : vector<8x512xf32>
    %142 = tpu.matmul %141, %139, %cst_107 {dimension_numbers = #tpu.dot_dimension_numbers<[1], [0], [0], [1], [0, 0, 1, 1], [], []>} : vector<8x8xf32>, vector<8x512xf32>, vector<8x512xf32> -> vector<8x512xf32>
    %143 = arith.addf %135, %142 : vector<8x512xf32>
    %c497_i32_108 = arith.constant 497 : i32
    %144 = tpu.dynamic_rotate %100 by %c497_i32_108 dim 1 : vector<8x512xf32>, i32 -> vector<8x512xf32>
    %c6_109 = arith.constant 6 : index
    %c0_110 = arith.constant 0 : index
    %145 = vector.load %arg2[%c6_109, %c0_110] : memref<9x512xf32, #tpu.memory_space<vmem>>, vector<1x512xf32>
    %146 = vector.broadcast %145 : vector<1x512xf32> to vector<8x512xf32>
    %147 = arith.mulf %144, %146 : vector<8x512xf32>
    %c1_111 = arith.constant 1 : index
    %c6_112 = arith.constant 6 : index
    %c0_113 = arith.constant 0 : index
    %c0_114 = arith.constant 0 : index
    %148 = vector.load %arg3[%c1_111, %c6_112, %c0_113, %c0_114] : memref<3x9x8x8xf32, #tpu.memory_space<vmem>>, vector<1x1x8x8xf32>
    %149 = vector.shape_cast %148 : vector<1x1x8x8xf32> to vector<8x8xf32>
    %cst_115 = arith.constant dense<0.000000e+00> : vector<8x512xf32>
    %150 = tpu.matmul %149, %147, %cst_115 {dimension_numbers = #tpu.dot_dimension_numbers<[1], [0], [0], [1], [0, 0, 1, 1], [], []>} : vector<8x8xf32>, vector<8x512xf32>, vector<8x512xf32> -> vector<8x512xf32>
    %151 = arith.addf %143, %150 : vector<8x512xf32>
    %c496_i32_116 = arith.constant 496 : i32
    %152 = tpu.dynamic_rotate %100 by %c496_i32_116 dim 1 : vector<8x512xf32>, i32 -> vector<8x512xf32>
    %c7_117 = arith.constant 7 : index
    %c0_118 = arith.constant 0 : index
    %153 = vector.load %arg2[%c7_117, %c0_118] : memref<9x512xf32, #tpu.memory_space<vmem>>, vector<1x512xf32>
    %154 = vector.broadcast %153 : vector<1x512xf32> to vector<8x512xf32>
    %155 = arith.mulf %152, %154 : vector<8x512xf32>
    %c1_119 = arith.constant 1 : index
    %c7_120 = arith.constant 7 : index
    %c0_121 = arith.constant 0 : index
    %c0_122 = arith.constant 0 : index
    %156 = vector.load %arg3[%c1_119, %c7_120, %c0_121, %c0_122] : memref<3x9x8x8xf32, #tpu.memory_space<vmem>>, vector<1x1x8x8xf32>
    %157 = vector.shape_cast %156 : vector<1x1x8x8xf32> to vector<8x8xf32>
    %cst_123 = arith.constant dense<0.000000e+00> : vector<8x512xf32>
    %158 = tpu.matmul %157, %155, %cst_123 {dimension_numbers = #tpu.dot_dimension_numbers<[1], [0], [0], [1], [0, 0, 1, 1], [], []>} : vector<8x8xf32>, vector<8x512xf32>, vector<8x512xf32> -> vector<8x512xf32>
    %159 = arith.addf %151, %158 : vector<8x512xf32>
    %c495_i32_124 = arith.constant 495 : i32
    %160 = tpu.dynamic_rotate %100 by %c495_i32_124 dim 1 : vector<8x512xf32>, i32 -> vector<8x512xf32>
    %c8_125 = arith.constant 8 : index
    %c0_126 = arith.constant 0 : index
    %161 = vector.load %arg2[%c8_125, %c0_126] : memref<9x512xf32, #tpu.memory_space<vmem>>, vector<1x512xf32>
    %162 = vector.broadcast %161 : vector<1x512xf32> to vector<8x512xf32>
    %163 = arith.mulf %160, %162 : vector<8x512xf32>
    %c1_127 = arith.constant 1 : index
    %c8_128 = arith.constant 8 : index
    %c0_129 = arith.constant 0 : index
    %c0_130 = arith.constant 0 : index
    %164 = vector.load %arg3[%c1_127, %c8_128, %c0_129, %c0_130] : memref<3x9x8x8xf32, #tpu.memory_space<vmem>>, vector<1x1x8x8xf32>
    %165 = vector.shape_cast %164 : vector<1x1x8x8xf32> to vector<8x8xf32>
    %cst_131 = arith.constant dense<0.000000e+00> : vector<8x512xf32>
    %166 = tpu.matmul %165, %163, %cst_131 {dimension_numbers = #tpu.dot_dimension_numbers<[1], [0], [0], [1], [0, 0, 1, 1], [], []>} : vector<8x8xf32>, vector<8x512xf32>, vector<8x512xf32> -> vector<8x512xf32>
    %167 = arith.addf %159, %166 : vector<8x512xf32>
    %c1_132 = arith.constant 1 : index
    %c0_133 = arith.constant 0 : index
    %c0_134 = arith.constant 0 : index
    %168 = vector.load %arg4[%c1_132, %c0_133, %c0_134] : memref<3x8x8xf32, #tpu.memory_space<vmem>>, vector<1x8x8xf32>
    %169 = vector.shape_cast %168 : vector<1x8x8xf32> to vector<8x8xf32>
    %170 = vector.extract_strided_slice %169 {offsets = [0, 0], sizes = [8, 1], strides = [1, 1]} : vector<8x8xf32> to vector<8x1xf32>
    %171 = vector.broadcast %170 : vector<8x1xf32> to vector<8x512xf32>
    %172 = arith.addf %167, %171 : vector<8x512xf32>
    %cst_135 = arith.constant 0.00999999977 : f32
    %173 = vector.broadcast %cst_135 : f32 to vector<8x512xf32>
    %174 = arith.mulf %173, %172 : vector<8x512xf32>
    %175 = arith.maximumf %172, %174 : vector<8x512xf32>
    %cst_136 = arith.constant dense<0.000000e+00> : vector<8xf32>
    %176 = vector.multi_reduction <add>, %175, %cst_136 [1] : vector<8x512xf32> to vector<8xf32>
    %177 = vector.shape_cast %176 : vector<8xf32> to vector<8x1xf32>
    %178 = arith.mulf %175, %175 : vector<8x512xf32>
    %cst_137 = arith.constant dense<0.000000e+00> : vector<8xf32>
    %179 = vector.multi_reduction <add>, %178, %cst_137 [1] : vector<8x512xf32> to vector<8xf32>
    %180 = vector.shape_cast %179 : vector<8xf32> to vector<8x1xf32>
    %cst_138 = arith.constant 0.001953125 : f32
    %181 = vector.broadcast %cst_138 : f32 to vector<8x1xf32>
    %182 = arith.mulf %177, %181 : vector<8x1xf32>
    %cst_139 = arith.constant 0.001953125 : f32
    %183 = vector.broadcast %cst_139 : f32 to vector<8x1xf32>
    %184 = arith.mulf %180, %183 : vector<8x1xf32>
    %185 = arith.mulf %182, %182 : vector<8x1xf32>
    %186 = arith.subf %184, %185 : vector<8x1xf32>
    %cst_140 = arith.constant 0.000000e+00 : f32
    %187 = vector.broadcast %cst_140 : f32 to vector<8x1xf32>
    %188 = arith.maximumf %186, %187 : vector<8x1xf32>
    %cst_141 = arith.constant 9.99999974E-6 : f32
    %189 = vector.broadcast %cst_141 : f32 to vector<8x1xf32>
    %190 = arith.addf %188, %189 : vector<8x1xf32>
    %191 = math.rsqrt %190 : vector<8x1xf32>
    %192 = vector.extract_strided_slice %169 {offsets = [0, 1], sizes = [8, 1], strides = [1, 1]} : vector<8x8xf32> to vector<8x1xf32>
    %193 = arith.mulf %191, %192 : vector<8x1xf32>
    %194 = vector.extract_strided_slice %169 {offsets = [0, 2], sizes = [8, 1], strides = [1, 1]} : vector<8x8xf32> to vector<8x1xf32>
    %195 = arith.mulf %182, %193 : vector<8x1xf32>
    %196 = arith.subf %194, %195 : vector<8x1xf32>
    %197 = vector.broadcast %193 : vector<8x1xf32> to vector<8x512xf32>
    %198 = arith.mulf %175, %197 : vector<8x512xf32>
    %199 = vector.broadcast %196 : vector<8x1xf32> to vector<8x512xf32>
    %200 = arith.addf %198, %199 : vector<8x512xf32>
    %c17_i32_142 = arith.constant 17 : i32
    %201 = tpu.dynamic_rotate %200 by %c17_i32_142 dim 1 : vector<8x512xf32>, i32 -> vector<8x512xf32>
    %c0_143 = arith.constant 0 : index
    %c0_144 = arith.constant 0 : index
    %202 = vector.load %arg2[%c0_143, %c0_144] : memref<9x512xf32, #tpu.memory_space<vmem>>, vector<1x512xf32>
    %203 = vector.broadcast %202 : vector<1x512xf32> to vector<8x512xf32>
    %204 = arith.mulf %201, %203 : vector<8x512xf32>
    %c2_145 = arith.constant 2 : index
    %c0_146 = arith.constant 0 : index
    %c0_147 = arith.constant 0 : index
    %c0_148 = arith.constant 0 : index
    %205 = vector.load %arg3[%c2_145, %c0_146, %c0_147, %c0_148] : memref<3x9x8x8xf32, #tpu.memory_space<vmem>>, vector<1x1x8x8xf32>
    %206 = vector.shape_cast %205 : vector<1x1x8x8xf32> to vector<8x8xf32>
    %cst_149 = arith.constant dense<0.000000e+00> : vector<8x512xf32>
    %207 = tpu.matmul %206, %204, %cst_149 {dimension_numbers = #tpu.dot_dimension_numbers<[1], [0], [0], [1], [0, 0, 1, 1], [], []>} : vector<8x8xf32>, vector<8x512xf32>, vector<8x512xf32> -> vector<8x512xf32>
    %c16_i32_150 = arith.constant 16 : i32
    %208 = tpu.dynamic_rotate %200 by %c16_i32_150 dim 1 : vector<8x512xf32>, i32 -> vector<8x512xf32>
    %c1_151 = arith.constant 1 : index
    %c0_152 = arith.constant 0 : index
    %209 = vector.load %arg2[%c1_151, %c0_152] : memref<9x512xf32, #tpu.memory_space<vmem>>, vector<1x512xf32>
    %210 = vector.broadcast %209 : vector<1x512xf32> to vector<8x512xf32>
    %211 = arith.mulf %208, %210 : vector<8x512xf32>
    %c2_153 = arith.constant 2 : index
    %c1_154 = arith.constant 1 : index
    %c0_155 = arith.constant 0 : index
    %c0_156 = arith.constant 0 : index
    %212 = vector.load %arg3[%c2_153, %c1_154, %c0_155, %c0_156] : memref<3x9x8x8xf32, #tpu.memory_space<vmem>>, vector<1x1x8x8xf32>
    %213 = vector.shape_cast %212 : vector<1x1x8x8xf32> to vector<8x8xf32>
    %cst_157 = arith.constant dense<0.000000e+00> : vector<8x512xf32>
    %214 = tpu.matmul %213, %211, %cst_157 {dimension_numbers = #tpu.dot_dimension_numbers<[1], [0], [0], [1], [0, 0, 1, 1], [], []>} : vector<8x8xf32>, vector<8x512xf32>, vector<8x512xf32> -> vector<8x512xf32>
    %215 = arith.addf %207, %214 : vector<8x512xf32>
    %c15_i32_158 = arith.constant 15 : i32
    %216 = tpu.dynamic_rotate %200 by %c15_i32_158 dim 1 : vector<8x512xf32>, i32 -> vector<8x512xf32>
    %c2_159 = arith.constant 2 : index
    %c0_160 = arith.constant 0 : index
    %217 = vector.load %arg2[%c2_159, %c0_160] : memref<9x512xf32, #tpu.memory_space<vmem>>, vector<1x512xf32>
    %218 = vector.broadcast %217 : vector<1x512xf32> to vector<8x512xf32>
    %219 = arith.mulf %216, %218 : vector<8x512xf32>
    %c2_161 = arith.constant 2 : index
    %c2_162 = arith.constant 2 : index
    %c0_163 = arith.constant 0 : index
    %c0_164 = arith.constant 0 : index
    %220 = vector.load %arg3[%c2_161, %c2_162, %c0_163, %c0_164] : memref<3x9x8x8xf32, #tpu.memory_space<vmem>>, vector<1x1x8x8xf32>
    %221 = vector.shape_cast %220 : vector<1x1x8x8xf32> to vector<8x8xf32>
    %cst_165 = arith.constant dense<0.000000e+00> : vector<8x512xf32>
    %222 = tpu.matmul %221, %219, %cst_165 {dimension_numbers = #tpu.dot_dimension_numbers<[1], [0], [0], [1], [0, 0, 1, 1], [], []>} : vector<8x8xf32>, vector<8x512xf32>, vector<8x512xf32> -> vector<8x512xf32>
    %223 = arith.addf %215, %222 : vector<8x512xf32>
    %c1_i32_166 = arith.constant 1 : i32
    %224 = tpu.dynamic_rotate %200 by %c1_i32_166 dim 1 : vector<8x512xf32>, i32 -> vector<8x512xf32>
    %c3_167 = arith.constant 3 : index
    %c0_168 = arith.constant 0 : index
    %225 = vector.load %arg2[%c3_167, %c0_168] : memref<9x512xf32, #tpu.memory_space<vmem>>, vector<1x512xf32>
    %226 = vector.broadcast %225 : vector<1x512xf32> to vector<8x512xf32>
    %227 = arith.mulf %224, %226 : vector<8x512xf32>
    %c2_169 = arith.constant 2 : index
    %c3_170 = arith.constant 3 : index
    %c0_171 = arith.constant 0 : index
    %c0_172 = arith.constant 0 : index
    %228 = vector.load %arg3[%c2_169, %c3_170, %c0_171, %c0_172] : memref<3x9x8x8xf32, #tpu.memory_space<vmem>>, vector<1x1x8x8xf32>
    %229 = vector.shape_cast %228 : vector<1x1x8x8xf32> to vector<8x8xf32>
    %cst_173 = arith.constant dense<0.000000e+00> : vector<8x512xf32>
    %230 = tpu.matmul %229, %227, %cst_173 {dimension_numbers = #tpu.dot_dimension_numbers<[1], [0], [0], [1], [0, 0, 1, 1], [], []>} : vector<8x8xf32>, vector<8x512xf32>, vector<8x512xf32> -> vector<8x512xf32>
    %231 = arith.addf %223, %230 : vector<8x512xf32>
    %c2_174 = arith.constant 2 : index
    %c4_175 = arith.constant 4 : index
    %c0_176 = arith.constant 0 : index
    %c0_177 = arith.constant 0 : index
    %232 = vector.load %arg3[%c2_174, %c4_175, %c0_176, %c0_177] : memref<3x9x8x8xf32, #tpu.memory_space<vmem>>, vector<1x1x8x8xf32>
    %233 = vector.shape_cast %232 : vector<1x1x8x8xf32> to vector<8x8xf32>
    %cst_178 = arith.constant dense<0.000000e+00> : vector<8x512xf32>
    %234 = tpu.matmul %233, %200, %cst_178 {dimension_numbers = #tpu.dot_dimension_numbers<[1], [0], [0], [1], [0, 0, 1, 1], [], []>} : vector<8x8xf32>, vector<8x512xf32>, vector<8x512xf32> -> vector<8x512xf32>
    %235 = arith.addf %231, %234 : vector<8x512xf32>
    %c511_i32_179 = arith.constant 511 : i32
    %236 = tpu.dynamic_rotate %200 by %c511_i32_179 dim 1 : vector<8x512xf32>, i32 -> vector<8x512xf32>
    %c5_180 = arith.constant 5 : index
    %c0_181 = arith.constant 0 : index
    %237 = vector.load %arg2[%c5_180, %c0_181] : memref<9x512xf32, #tpu.memory_space<vmem>>, vector<1x512xf32>
    %238 = vector.broadcast %237 : vector<1x512xf32> to vector<8x512xf32>
    %239 = arith.mulf %236, %238 : vector<8x512xf32>
    %c2_182 = arith.constant 2 : index
    %c5_183 = arith.constant 5 : index
    %c0_184 = arith.constant 0 : index
    %c0_185 = arith.constant 0 : index
    %240 = vector.load %arg3[%c2_182, %c5_183, %c0_184, %c0_185] : memref<3x9x8x8xf32, #tpu.memory_space<vmem>>, vector<1x1x8x8xf32>
    %241 = vector.shape_cast %240 : vector<1x1x8x8xf32> to vector<8x8xf32>
    %cst_186 = arith.constant dense<0.000000e+00> : vector<8x512xf32>
    %242 = tpu.matmul %241, %239, %cst_186 {dimension_numbers = #tpu.dot_dimension_numbers<[1], [0], [0], [1], [0, 0, 1, 1], [], []>} : vector<8x8xf32>, vector<8x512xf32>, vector<8x512xf32> -> vector<8x512xf32>
    %243 = arith.addf %235, %242 : vector<8x512xf32>
    %c497_i32_187 = arith.constant 497 : i32
    %244 = tpu.dynamic_rotate %200 by %c497_i32_187 dim 1 : vector<8x512xf32>, i32 -> vector<8x512xf32>
    %c6_188 = arith.constant 6 : index
    %c0_189 = arith.constant 0 : index
    %245 = vector.load %arg2[%c6_188, %c0_189] : memref<9x512xf32, #tpu.memory_space<vmem>>, vector<1x512xf32>
    %246 = vector.broadcast %245 : vector<1x512xf32> to vector<8x512xf32>
    %247 = arith.mulf %244, %246 : vector<8x512xf32>
    %c2_190 = arith.constant 2 : index
    %c6_191 = arith.constant 6 : index
    %c0_192 = arith.constant 0 : index
    %c0_193 = arith.constant 0 : index
    %248 = vector.load %arg3[%c2_190, %c6_191, %c0_192, %c0_193] : memref<3x9x8x8xf32, #tpu.memory_space<vmem>>, vector<1x1x8x8xf32>
    %249 = vector.shape_cast %248 : vector<1x1x8x8xf32> to vector<8x8xf32>
    %cst_194 = arith.constant dense<0.000000e+00> : vector<8x512xf32>
    %250 = tpu.matmul %249, %247, %cst_194 {dimension_numbers = #tpu.dot_dimension_numbers<[1], [0], [0], [1], [0, 0, 1, 1], [], []>} : vector<8x8xf32>, vector<8x512xf32>, vector<8x512xf32> -> vector<8x512xf32>
    %251 = arith.addf %243, %250 : vector<8x512xf32>
    %c496_i32_195 = arith.constant 496 : i32
    %252 = tpu.dynamic_rotate %200 by %c496_i32_195 dim 1 : vector<8x512xf32>, i32 -> vector<8x512xf32>
    %c7_196 = arith.constant 7 : index
    %c0_197 = arith.constant 0 : index
    %253 = vector.load %arg2[%c7_196, %c0_197] : memref<9x512xf32, #tpu.memory_space<vmem>>, vector<1x512xf32>
    %254 = vector.broadcast %253 : vector<1x512xf32> to vector<8x512xf32>
    %255 = arith.mulf %252, %254 : vector<8x512xf32>
    %c2_198 = arith.constant 2 : index
    %c7_199 = arith.constant 7 : index
    %c0_200 = arith.constant 0 : index
    %c0_201 = arith.constant 0 : index
    %256 = vector.load %arg3[%c2_198, %c7_199, %c0_200, %c0_201] : memref<3x9x8x8xf32, #tpu.memory_space<vmem>>, vector<1x1x8x8xf32>
    %257 = vector.shape_cast %256 : vector<1x1x8x8xf32> to vector<8x8xf32>
    %cst_202 = arith.constant dense<0.000000e+00> : vector<8x512xf32>
    %258 = tpu.matmul %257, %255, %cst_202 {dimension_numbers = #tpu.dot_dimension_numbers<[1], [0], [0], [1], [0, 0, 1, 1], [], []>} : vector<8x8xf32>, vector<8x512xf32>, vector<8x512xf32> -> vector<8x512xf32>
    %259 = arith.addf %251, %258 : vector<8x512xf32>
    %c495_i32_203 = arith.constant 495 : i32
    %260 = tpu.dynamic_rotate %200 by %c495_i32_203 dim 1 : vector<8x512xf32>, i32 -> vector<8x512xf32>
    %c8_204 = arith.constant 8 : index
    %c0_205 = arith.constant 0 : index
    %261 = vector.load %arg2[%c8_204, %c0_205] : memref<9x512xf32, #tpu.memory_space<vmem>>, vector<1x512xf32>
    %262 = vector.broadcast %261 : vector<1x512xf32> to vector<8x512xf32>
    %263 = arith.mulf %260, %262 : vector<8x512xf32>
    %c2_206 = arith.constant 2 : index
    %c8_207 = arith.constant 8 : index
    %c0_208 = arith.constant 0 : index
    %c0_209 = arith.constant 0 : index
    %264 = vector.load %arg3[%c2_206, %c8_207, %c0_208, %c0_209] : memref<3x9x8x8xf32, #tpu.memory_space<vmem>>, vector<1x1x8x8xf32>
    %265 = vector.shape_cast %264 : vector<1x1x8x8xf32> to vector<8x8xf32>
    %cst_210 = arith.constant dense<0.000000e+00> : vector<8x512xf32>
    %266 = tpu.matmul %265, %263, %cst_210 {dimension_numbers = #tpu.dot_dimension_numbers<[1], [0], [0], [1], [0, 0, 1, 1], [], []>} : vector<8x8xf32>, vector<8x512xf32>, vector<8x512xf32> -> vector<8x512xf32>
    %267 = arith.addf %259, %266 : vector<8x512xf32>
    %c2_211 = arith.constant 2 : index
    %c0_212 = arith.constant 0 : index
    %c0_213 = arith.constant 0 : index
    %268 = vector.load %arg4[%c2_211, %c0_212, %c0_213] : memref<3x8x8xf32, #tpu.memory_space<vmem>>, vector<1x8x8xf32>
    %269 = vector.shape_cast %268 : vector<1x8x8xf32> to vector<8x8xf32>
    %270 = vector.extract_strided_slice %269 {offsets = [0, 0], sizes = [8, 1], strides = [1, 1]} : vector<8x8xf32> to vector<8x1xf32>
    %271 = vector.broadcast %270 : vector<8x1xf32> to vector<8x512xf32>
    %272 = arith.addf %267, %271 : vector<8x512xf32>
    %cst_214 = arith.constant 0.00999999977 : f32
    %273 = vector.broadcast %cst_214 : f32 to vector<8x512xf32>
    %274 = arith.mulf %273, %272 : vector<8x512xf32>
    %275 = arith.maximumf %272, %274 : vector<8x512xf32>
    %cst_215 = arith.constant dense<0.000000e+00> : vector<8xf32>
    %276 = vector.multi_reduction <add>, %275, %cst_215 [1] : vector<8x512xf32> to vector<8xf32>
    %277 = vector.shape_cast %276 : vector<8xf32> to vector<8x1xf32>
    %278 = arith.mulf %275, %275 : vector<8x512xf32>
    %cst_216 = arith.constant dense<0.000000e+00> : vector<8xf32>
    %279 = vector.multi_reduction <add>, %278, %cst_216 [1] : vector<8x512xf32> to vector<8xf32>
    %280 = vector.shape_cast %279 : vector<8xf32> to vector<8x1xf32>
    %cst_217 = arith.constant 0.001953125 : f32
    %281 = vector.broadcast %cst_217 : f32 to vector<8x1xf32>
    %282 = arith.mulf %277, %281 : vector<8x1xf32>
    %cst_218 = arith.constant 0.001953125 : f32
    %283 = vector.broadcast %cst_218 : f32 to vector<8x1xf32>
    %284 = arith.mulf %280, %283 : vector<8x1xf32>
    %285 = arith.mulf %282, %282 : vector<8x1xf32>
    %286 = arith.subf %284, %285 : vector<8x1xf32>
    %cst_219 = arith.constant 0.000000e+00 : f32
    %287 = vector.broadcast %cst_219 : f32 to vector<8x1xf32>
    %288 = arith.maximumf %286, %287 : vector<8x1xf32>
    %cst_220 = arith.constant 9.99999974E-6 : f32
    %289 = vector.broadcast %cst_220 : f32 to vector<8x1xf32>
    %290 = arith.addf %288, %289 : vector<8x1xf32>
    %291 = math.rsqrt %290 : vector<8x1xf32>
    %292 = vector.extract_strided_slice %269 {offsets = [0, 1], sizes = [8, 1], strides = [1, 1]} : vector<8x8xf32> to vector<8x1xf32>
    %293 = arith.mulf %291, %292 : vector<8x1xf32>
    %294 = vector.extract_strided_slice %269 {offsets = [0, 2], sizes = [8, 1], strides = [1, 1]} : vector<8x8xf32> to vector<8x1xf32>
    %295 = arith.mulf %282, %293 : vector<8x1xf32>
    %296 = arith.subf %294, %295 : vector<8x1xf32>
    %297 = vector.broadcast %293 : vector<8x1xf32> to vector<8x512xf32>
    %298 = arith.mulf %275, %297 : vector<8x512xf32>
    %299 = vector.broadcast %296 : vector<8x1xf32> to vector<8x512xf32>
    %300 = arith.addf %298, %299 : vector<8x512xf32>
    %c0_221 = arith.constant 0 : index
    %c0_222 = arith.constant 0 : index
    %301 = vector.load %arg5[%c0_221, %c0_222] : memref<8x512xf32, #tpu.memory_space<vmem>>, vector<8x512xf32>
    tpu.vector_store %arg5[%c0_221, %c0_222], %300 {strides = array<i32>} : memref<8x512xf32, #tpu.memory_space<vmem>>, vector<8x512xf32>,
    return
  }
  func.func @transform_0(%arg0: i32) -> (i32, i32) {
    %c0_i32 = arith.constant 0 : i32
    %c0_i32_0 = arith.constant 0 : i32
    %c0_i32_1 = arith.constant 0 : i32
    return %c0_i32, %c0_i32_0 : i32, i32
  }
  func.func @transform_1(%arg0: i32) -> (i32, i32) {
    %c0_i32 = arith.constant 0 : i32
    %c0_i32_0 = arith.constant 0 : i32
    %c0_i32_1 = arith.constant 0 : i32
    return %c0_i32, %c0_i32_0 : i32, i32
  }
  func.func @transform_2(%arg0: i32) -> (i32, i32, i32, i32) {
    %c0_i32 = arith.constant 0 : i32
    %c0_i32_0 = arith.constant 0 : i32
    %c0_i32_1 = arith.constant 0 : i32
    %c0_i32_2 = arith.constant 0 : i32
    %c0_i32_3 = arith.constant 0 : i32
    return %c0_i32, %c0_i32_0, %c0_i32_1, %c0_i32_2 : i32, i32, i32, i32
  }
  func.func @transform_3(%arg0: i32) -> (i32, i32, i32) {
    %c0_i32 = arith.constant 0 : i32
    %c0_i32_0 = arith.constant 0 : i32
    %c0_i32_1 = arith.constant 0 : i32
    %c0_i32_2 = arith.constant 0 : i32
    return %c0_i32, %c0_i32_0, %c0_i32_1 : i32, i32, i32
  }
  func.func @transform_4(%arg0: i32) -> (i32, i32) {
    %c0_i32 = arith.constant 0 : i32
    %c0_i32_0 = arith.constant 0 : i32
    %c0_i32_1 = arith.constant 0 : i32
    return %c0_i32, %c0_i32_0 : i32, i32
  }
}

</mosaic_0001>

<bundles_post_ra>
// kernel: spatial_attention_block_presum.1
= control target key start
LH: loop header
LB: loop body
LE: loop exit
PB: predicated region body
PF: predicated region fallthrough
CT: control target
= control target key end

     0   :  { %v5066_v2 = vmov 0.0   ;;  %s5067_s19 = smov 16   ;;  %s5068_s24 = smov 17   ;;  %v5075_v5 = vmov 0   ;;  %v29_v7 = vlaneseq  ;;  %vm105_vm2 = vcmask 64512   ;;  %s6007_s0 = inlined_call_operand.vmem [shape: f32[8,512], index: 0, kind: input, shape index: {}]   ;;  %s6008_s3 = inlined_call_operand.vmem [shape: f32[3,8,8], index: 3, kind: input, shape index: {}]   ;;  %s6009_s1 = inlined_call_operand.vmem [shape: f32[9,512], index: 1, kind: input, shape index: {}]   ;;  %s6010_s2 = inlined_call_operand.vmem [shape: f32[3,9,8,8], index: 2, kind: input, shape index: {}]   ;;  %s6011_s4 = inlined_call_operand.vmem [shape: f32[8,512], index: 4, kind: output, shape index: {}]  }
   0x1   :  { %v5106_v0 = vld [vmem:[%s6007_s0 + $0x18] sm:$0xff]  ;;  %v5111_v1 = vld [vmem:[%s6007_s0] sm:$0xff]  ;;  %173 = vmatprep.mubr.f32.mxu0 %v5066_v2  ;;  %244 = vmatprep.mubr.f32.mxu1 %v5066_v2  ;;  %v5122_v3 = vld [vmem:[%s6007_s0 + $0x10] sm:$0xff]  ;;  %s5070_s25 = smov 1   ;;  %s5071_s26 = smov 127  }
   0x2   :  { %69 = vrot.lane.b32.xlu1 %v5106_v0, %s5067_s19  ;;  %63 = vrot.lane.b32.xlu0 %v5111_v1, %s5067_s19  ;;  %v5127_v4 = vld [vmem:[%s6007_s0 + $0x8] sm:$0xff]  ;;  %s5069_s0 = smov 15   ;;  %s5072_s27 = smov 113   ;;  %v5193_v6 = vld [vmem:[%s6008_s3] sm:$0xff]  ;;  %v39_v8 = vshrl.u32 %v29_v7, 7  ;;  %v5196_v9 = vand.u32 127, %v29_v7 }
   0x3   :  { %s5073_s28 = smov 112   ;;  %s5074_s29 = smov 111   ;;  %5050 = vset.pattern.permute.xlu0 %v5075_v5  ;;  %v4853_v16 = vld [vmem:[%s6009_s1 + $0x1] ss:$8 sm:$0xf] }
   0x4   :  { %v5198_v10 = vsub.s32 3, %v39_v8  ;;  %v5200_v11 = vsub.s32 1, %v39_v8  ;;  %v5202_v12 = vsub.s32 2, %v39_v8  ;;  %v5204_v13 = vsub.s32 0, %v39_v8  ;;  %v4854_v33 = vld [vmem:[%s6010_s2 + $0x8] sm:$0xff]  ;;  %v62_v51 = vld [vmem:[%s6010_s2] sm:$0xff] }
   0x5   :  { %vm71_vm0 = vcmp.lt.s32.totalorder %v5196_v9, 16  ;;  %v36_v21 = vld [vmem:[%s6009_s1] ss:$8 sm:$0xf]  ;;  %vm31_vm1 = vcmp.lt.s32.totalorder %v5196_v9, 17  ;;  %vm404_vm3 = vcmp.lt.s32.totalorder %v5196_v9, 15 }
   0x6   :  { %67 = vrot.lane.b32.xlu1 %v5122_v3, %s5067_s19  ;;  %65 = vrot.lane.b32.xlu0 %v5127_v4, %s5067_s19  ;;  %v5211_v17 = vrot.slane %v4853_v16, %v5198_v10  ;;  %v5214_v18 = vrot.slane %v4853_v16, %v5200_v11  ;;  %v5217_v19 = vrot.slane %v4853_v16, %v5202_v12  ;;  %v4859_v41 = vld [vmem:[%s6009_s1 + $0x2] ss:$8 sm:$0xf]  ;;  %v4863_v59 = vld [vmem:[%s6009_s1 + $0x3] ss:$8 sm:$0xf] }
   0x7   :  { %v5220_v20 = vrot.slane %v4853_v16, %v5204_v13  ;;  %v5238_v31 = vrot.slane %v36_v21, %v5200_v11  ;;  %v5247_v37 = vrot.slane %v36_v21, %v5202_v12  ;;  %v5252_v38 = vrot.slane %v36_v21, %v5204_v13 }
   0x8   :  { %v5256_v40 = vrot.slane %v36_v21, %v5198_v10  ;;  %v5274_v50 = vrot.slane %v4859_v41, %v5200_v11  ;;  %v5282_v55 = vrot.slane %v4859_v41, %v5202_v12  ;;  %v5288_v57 = vrot.slane %v4859_v41, %v5204_v13  ;;  %v4860_v21 = vld [vmem:[%s6010_s2 + $0x10] sm:$0xff] }
   0x9   :  { %v5291_v58 = vrot.slane %v4859_v41, %v5198_v10  ;;  %vm595_vm4 = vcmp.lt.s32.totalorder %v5196_v9, 1  ;;  %v5309_v16 = vrot.slane %v4863_v59, %v5200_v11  ;;  %vm937_vm5 = vcmp.lt.s32.totalorder %v5196_v9, 127 }
   0xa   :  { %23 = vrot.lane.b32.xlu1 %v5127_v4, %s5068_s24  ;;  %21 = vrot.lane.b32.xlu0 %v5111_v1, %s5068_s24  ;;  %vm1128_vm6 = vcmp.lt.s32.totalorder %v5196_v9, 113  ;;  %vm1319_vm7 = vcmp.lt.s32.totalorder %v5196_v9, 112  ;;  %vm1510_vm8 = vcmp.lt.s32.totalorder %v5196_v9, 111 }
   0xe   :  { %25 = vrot.lane.b32.xlu1 %v5122_v3, %s5068_s24  ;;  %27 = vrot.lane.b32.xlu0 %v5106_v0, %s5068_s24 }
  0x12   :  { %398 = vrot.lane.b32.xlu1 %v5127_v4, %s5069_s0  ;;  %396 = vrot.lane.b32.xlu0 %v5111_v1, %s5069_s0 }
  0x16   :  { %400 = vrot.lane.b32.xlu1 %v5122_v3, %s5069_s0  ;;  %402 = vrot.lane.b32.xlu0 %v5106_v0, %s5069_s0 }
  0x1a   :  { %589 = vrot.lane.b32.xlu1 %v5127_v4, %s5070_s25  ;;  %587 = vrot.lane.b32.xlu0 %v5111_v1, %s5070_s25 }
  0x1e   :  { %591 = vrot.lane.b32.xlu1 %v5122_v3, %s5070_s25  ;;  %593 = vrot.lane.b32.xlu0 %v5106_v0, %s5070_s25 }
  0x22   :  { %931 = vrot.lane.b32.xlu0 %v5127_v4, %s5071_s26  ;;  %933 = vrot.lane.b32.xlu1 %v5122_v3, %s5071_s26 }
  0x26   :  { %929 = vrot.lane.b32.xlu0 %v5111_v1, %s5071_s26  ;;  %935 = vrot.lane.b32.xlu1 %v5106_v0, %s5071_s26 }
  0x2a   :  { %1122 = vrot.lane.b32.xlu0 %v5127_v4, %s5072_s27  ;;  %1124 = vrot.lane.b32.xlu1 %v5122_v3, %s5072_s27 }
  0x2e   :  { %1120 = vrot.lane.b32.xlu0 %v5111_v1, %s5072_s27  ;;  %1126 = vrot.lane.b32.xlu1 %v5106_v0, %s5072_s27 }
  0x32   :  { %1313 = vrot.lane.b32.xlu0 %v5127_v4, %s5073_s28  ;;  %1315 = vrot.lane.b32.xlu1 %v5122_v3, %s5073_s28 }
  0x36   :  { %1311 = vrot.lane.b32.xlu0 %v5111_v1, %s5073_s28  ;;  %1317 = vrot.lane.b32.xlu1 %v5106_v0, %s5073_s28 }
  0x3a   :  { %1504 = vrot.lane.b32.xlu0 %v5127_v4, %s5074_s29  ;;  %1506 = vrot.lane.b32.xlu1 %v5122_v3, %s5074_s29 }
  0x3e   :  { %1502 = vrot.lane.b32.xlu0 %v5111_v1, %s5074_s29  ;;  %1508 = vrot.lane.b32.xlu1 %v5106_v0, %s5074_s29 }
  0x42   :  { %1696 = vperm.xlu0 %5050, %v5193_v6  }
  0x74   :  { %v70_v14 = vpop.permute.xlu1 %69  ;;  %v64_v15 = vpop.permute.xlu0 %63 }
  0x75   :  { %v75_v24 = vsel %vm71_vm0, %v70_v14, %v64_v15 }
  0x76   :  { %v99_v32 = vmul.f32 %v5220_v20, %v75_v24 }
  0x78   :  { %v68_v22 = vpop.permute.xlu1 %67  ;;  %v66_v23 = vpop.permute.xlu0 %65 }
  0x79   :  { %v72_v25 = vsel %vm71_vm0, %v68_v22, %v70_v14  ;;  %v74_v26 = vsel %vm71_vm0, %v64_v15, %v66_v23  ;;  %v73_v27 = vsel %vm71_vm0, %v66_v23, %v68_v22 }
  0x7a   :  { %v102_v28 = vmul.f32 %v5211_v17, %v72_v25  ;;  %v100_v29 = vmul.f32 %v5214_v18, %v74_v26  ;;  %v101_v30 = vmul.f32 %v5217_v19, %v73_v27  ;;  %v5317_v25 = vrot.slane %v4863_v59, %v5202_v12 }
  0x7b   :  { %v5323_v27 = vrot.slane %v4863_v59, %v5204_v13 }
  0x7c   :  { %180 = vmatprep.subr.mxu1 %v102_v28  ;;  %v24_v34 = vpop.permute.xlu1 %23  ;;  %109 = vmatprep.subr.mxu0 %v100_v29  ;;  %v22_v35 = vpop.permute.xlu0 %21  ;;  %v5326_v28 = vrot.slane %v4863_v59, %v5198_v10  ;;  %v4870_v29 = vld [vmem:[%s6009_s1 + $0x5] ss:$8 sm:$0xf] }
  0x7d   :  { %v34_v36 = vsel %vm31_vm1, %v22_v35, %v24_v34  ;;  %110 = vmatpush1.msra.mxu0 %v99_v32  ;;  %181 = vmatpush1.msra.mxu1 %v101_v30 }
  0x7e   :  { %4855 = vmatmul.mubr.msk.f32.vlgmr.msra.gmra.mrb[0].mxu0 %vm105_vm2, %v4854_v33  ;;  %4856 = vmatmul.mubr.msk.f32.vlgmr.msra.gmra.mrb[0].mxu1 %vm105_vm2, %v4854_v33  ;;  %v59_v39 = vmul.f32 %v5238_v31, %v34_v36 }
  0x7f   :  { %318 = vmatprep.mubr.f32.mxu0 %v5066_v2  ;;  %389 = vmatprep.mubr.f32.mxu1 %v5066_v2 }
  0x80   :  { %v26_v42 = vpop.permute.xlu1 %25  ;;  %v28_v43 = vpop.permute.xlu0 %27  ;;  %254 = vmatprep.subr.mxu0 %v59_v39 }
  0x81   :  { %v33_v44 = vsel %vm31_vm1, %v24_v34, %v26_v42  ;;  %v32_v45 = vsel %vm31_vm1, %v26_v42, %v28_v43  ;;  %v35_v46 = vsel %vm31_vm1, %v28_v43, %v22_v35  ;;  %v5344_v42 = vrot.slane %v4870_v29, %v5200_v11  ;;  %v4864_v43 = vld [vmem:[%s6010_s2 + $0x18] sm:$0xff] }
  0x82   :  { %v60_v47 = vmul.f32 %v5247_v37, %v33_v44  ;;  %v58_v48 = vmul.f32 %v5252_v38, %v35_v46  ;;  %v61_v49 = vmul.f32 %v5256_v40, %v32_v45 }
  0x84   :  { %v399_v52 = vpop.permute.xlu1 %398  ;;  %255 = vmatpush1.msra.mxu0 %v58_v48  ;;  %325 = vmatprep.subr.mxu1 %v61_v49  ;;  %v397_v53 = vpop.permute.xlu0 %396  ;;  %v5356_v48 = vrot.slane %v4870_v29, %v5198_v10  ;;  %v5361_v49 = vrot.slane %v4870_v29, %v5204_v13 }
  0x85   :  { %v407_v54 = vsel %vm404_vm3, %v397_v53, %v399_v52  ;;  %326 = vmatpush1.msra.mxu1 %v60_v47 }
  0x86   :  { %v433_v56 = vmul.f32 %v5274_v50, %v407_v54  ;;  %4857 = vmatmul.mubr.msk.f32.vlgmr.msra.gmra.mrb[0].mxu0 %vm105_vm2, %v62_v51  ;;  %4858 = vmatmul.mubr.msk.f32.vlgmr.msra.gmra.mrb[0].mxu1 %vm105_vm2, %v62_v51  ;;  %v5364_v51 = vrot.slane %v4870_v29, %v5202_v12 }
  0x87   :  { %505 = vmatprep.mubr.f32.mxu0 %v5066_v2  ;;  %576 = vmatprep.mubr.f32.mxu1 %v5066_v2 }
  0x88   :  { %v401_v60 = vpop.permute.xlu1 %400  ;;  %v403_v61 = vpop.permute.xlu0 %402  ;;  %441 = vmatprep.subr.mxu0 %v433_v56 }
  0x89   :  { %v406_v62 = vsel %vm404_vm3, %v399_v52, %v401_v60  ;;  %v405_v63 = vsel %vm404_vm3, %v401_v60, %v403_v61  ;;  %v408_v7 = vsel %vm404_vm3, %v403_v61, %v397_v53  ;;  %v4867_v61 = vld [vmem:[%s6010_s2 + $0x20] sm:$0xff] }
  0x8a   :  { %v434_v8 = vmul.f32 %v5282_v55, %v406_v62  ;;  %v432_v14 = vmul.f32 %v5288_v57, %v408_v7  ;;  %v435_v15 = vmul.f32 %v5291_v58, %v405_v63 }
  0x8c   :  { %v590_v22 = vpop.permute.xlu1 %589  ;;  %442 = vmatpush1.msra.mxu0 %v432_v14  ;;  %512 = vmatprep.subr.mxu1 %v435_v15  ;;  %v588_v23 = vpop.permute.xlu0 %587 }
  0x8d   :  { %v598_v24 = vsel %vm595_vm4, %v588_v23, %v590_v22  ;;  %513 = vmatpush1.msra.mxu1 %v434_v8 }
  0x8e   :  { %v624_v26 = vmul.f32 %v5309_v16, %v598_v24  ;;  %4861 = vmatmul.mubr.msk.f32.vlgmr.msra.gmra.mrb[0].mxu0 %vm105_vm2, %v4860_v21  ;;  %4862 = vmatmul.mubr.msk.f32.vlgmr.msra.gmra.mrb[0].mxu1 %vm105_vm2, %v4860_v21 }
  0x8f   :  { %696 = vmatprep.mubr.f32.mxu0 %v5066_v2  ;;  %767 = vmatprep.mubr.f32.mxu1 %v5066_v2 }
  0x90   :  { %v592_v30 = vpop.permute.xlu1 %591  ;;  %v594_v32 = vpop.permute.xlu0 %593  ;;  %632 = vmatprep.subr.mxu0 %v624_v26 }
  0x91   :  { %v597_v33 = vsel %vm595_vm4, %v590_v22, %v592_v30  ;;  %v596_v34 = vsel %vm595_vm4, %v592_v30, %v594_v32  ;;  %v599_v35 = vsel %vm595_vm4, %v594_v32, %v588_v23  ;;  %v4878_v22 = vld [vmem:[%s6009_s1 + $0x7] ss:$8 sm:$0xf] }
  0x92   :  { %v625_v36 = vmul.f32 %v5317_v25, %v597_v33  ;;  %v623_v39 = vmul.f32 %v5323_v27, %v599_v35  ;;  %v626_v41 = vmul.f32 %v5326_v28, %v596_v34  ;;  %v5415_v32 = vrot.slane %v4878_v22, %v5200_v11 }
  0x94   :  { %633 = vmatpush1.msra.mxu0 %v623_v39  ;;  %703 = vmatprep.subr.mxu1 %v626_v41  ;;  %v932_v44 = vpop.permute.xlu0 %931  ;;  %v934_v45 = vpop.permute.xlu1 %933 }
  0x95   :  { %704 = vmatpush1.msra.mxu1 %v625_v36  ;;  %v939_v46 = vsel %vm937_vm5, %v932_v44, %v934_v45  ;;  %783 = vmatprep.subr.mxu0 %v5127_v4  ;;  %v4874_v4 = vld [vmem:[%s6009_s1 + $0x6] ss:$8 sm:$0xf] }
  0x96   :  { %4865 = vmatmul.mubr.msk.f32.vlgmr.msra.gmra.mrb[0].mxu0 %vm105_vm2, %v4864_v43  ;;  %4866 = vmatmul.mubr.msk.f32.vlgmr.msra.gmra.mrb[0].mxu1 %vm105_vm2, %v4864_v43  ;;  %v966_v47 = vmul.f32 %v5344_v42, %v939_v46  ;;  %v5394_v14 = vrot.slane %v4874_v4, %v5198_v10  ;;  %v5397_v15 = vrot.slane %v4874_v4, %v5204_v13  ;;  %v4871_v36 = vld [vmem:[%s6010_s2 + $0x28] sm:$0xff] }
  0x97   :  { %854 = vmatprep.subr.mxu1 %v5106_v0  ;;  %784 = vmatpush1.msra.mxu0 %v5111_v1  ;;  %v5400_v21 = vrot.slane %v4874_v4, %v5202_v12  ;;  %v5432_v46 = vrot.slane %v4878_v22, %v5204_v13 }
  0x98   :  { %847 = vmatprep.mubr.f32.mxu0 %v5066_v2  ;;  %855 = vmatpush1.msra.mxu1 %v5122_v3  ;;  %v930_v52 = vpop.permute.xlu0 %929  ;;  %v936_v53 = vpop.permute.xlu1 %935  ;;  %v5381_v3 = vrot.slane %v4874_v4, %v5200_v11  ;;  %v4882_v4 = vld [vmem:[%s6009_s1 + $0x20] ss:$8 sm:$0xf] }
  0x99   :  { %918 = vmatprep.mubr.f32.mxu1 %v5066_v2  ;;  %v940_v0 = vsel %vm937_vm5, %v930_v52, %v932_v44  ;;  %v938_v1 = vsel %vm937_vm5, %v934_v45, %v936_v53  ;;  %v941_v54 = vsel %vm937_vm5, %v936_v53, %v930_v52  ;;  %974 = vmatprep.subr.mxu0 %v966_v47 }
  0x9a   :  { %v968_v56 = vmul.f32 %v5356_v48, %v941_v54  ;;  %v965_v59 = vmul.f32 %v5361_v49, %v940_v0  ;;  %v967_v60 = vmul.f32 %v5364_v51, %v938_v1  ;;  %v5429_v45 = vrot.slane %v4878_v22, %v5198_v10 }
  0x9b   :  { %v5435_v47 = vrot.slane %v4878_v22, %v5202_v12  ;;  %v5464_v22 = vrot.slane %v4882_v4, %v5198_v10 }
  0x9c   :  { %v1123_v62 = vpop.permute.xlu0 %1122  ;;  %v1125_v63 = vpop.permute.xlu1 %1124  ;;  %1045 = vmatprep.subr.mxu1 %v968_v56 }
  0x9d   :  { %v1130_v7 = vsel %vm1128_vm6, %v1123_v62, %v1125_v63 }
  0x9e   :  { %4868 = vmatmul.mubr.msk.f32.vlgmr.msra.gmra.mrb[0].mxu0 %vm105_vm2, %v4867_v61  ;;  %4869 = vmatmul.mubr.msk.f32.vlgmr.msra.gmra.mrb[0].mxu1 %vm105_vm2, %v4867_v61  ;;  %v1157_v8 = vmul.f32 %v5381_v3, %v1130_v7 }
  0x9f   :  { %975 = vmatpush1.msra.mxu0 %v965_v59  ;;  %1046 = vmatpush1.msra.mxu1 %v967_v60  ;;  %v5451_v59 = vrot.slane %v4882_v4, %v5200_v11 }
  0xa0   :  { %1038 = vmatprep.mubr.f32.mxu0 %v5066_v2  ;;  %1109 = vmatprep.mubr.f32.mxu1 %v5066_v2  ;;  %v1121_v23 = vpop.permute.xlu0 %1120  ;;  %v1127_v24 = vpop.permute.xlu1 %1126 }
  0xa1   :  { %v1131_v26 = vsel %vm1128_vm6, %v1121_v23, %v1123_v62  ;;  %v1129_v29 = vsel %vm1128_vm6, %v1125_v63, %v1127_v24  ;;  %v1132_v30 = vsel %vm1128_vm6, %v1127_v24, %v1121_v23  ;;  %1165 = vmatprep.subr.mxu0 %v1157_v8  ;;  %v4875_v62 = vld [vmem:[%s6010_s2 + $0x30] sm:$0xff]  ;;  %v5467_v23 = vrot.slane %v4882_v4, %v5204_v13 }
  0xa2   :  { %v1159_v33 = vmul.f32 %v5394_v14, %v1132_v30  ;;  %v1156_v34 = vmul.f32 %v5397_v15, %v1131_v26  ;;  %v1158_v35 = vmul.f32 %v5400_v21, %v1129_v29  ;;  %v5470_v24 = vrot.slane %v4882_v4, %v5202_v12 }
  0xa4   :  { %v1314_v39 = vpop.permute.xlu0 %1313  ;;  %v1316_v41 = vpop.permute.xlu1 %1315  ;;  %1236 = vmatprep.subr.mxu1 %v1159_v33 }
  0xa5   :  { %v1321_v43 = vsel %vm1319_vm7, %v1314_v39, %v1316_v41 }
  0xa6   :  { %4872 = vmatmul.mubr.msk.f32.vlgmr.msra.gmra.mrb[0].mxu0 %vm105_vm2, %v4871_v36  ;;  %4873 = vmatmul.mubr.msk.f32.vlgmr.msra.gmra.mrb[0].mxu1 %vm105_vm2, %v4871_v36  ;;  %v1348_v44 = vmul.f32 %v5415_v32, %v1321_v43  ;;  %v4883_v36 = vld [vmem:[%s6010_s2 + $0x40] sm:$0xff] }
  0xa7   :  { %1166 = vmatpush1.msra.mxu0 %v1156_v34  ;;  %1237 = vmatpush1.msra.mxu1 %v1158_v35  ;;  %v4879_v35 = vld [vmem:[%s6010_s2 + $0x38] sm:$0xff] }
  0xa8   :  { %1229 = vmatprep.mubr.f32.mxu0 %v5066_v2  ;;  %1300 = vmatprep.mubr.f32.mxu1 %v5066_v2  ;;  %v1312_v52 = vpop.permute.xlu0 %1311  ;;  %v1318_v53 = vpop.permute.xlu1 %1317 }
  0xa9   :  { %v1322_v0 = vsel %vm1319_vm7, %v1312_v52, %v1314_v39  ;;  %v1320_v1 = vsel %vm1319_vm7, %v1316_v41, %v1318_v53  ;;  %v1323_v54 = vsel %vm1319_vm7, %v1318_v53, %v1312_v52  ;;  %1356 = vmatprep.subr.mxu0 %v1348_v44 }
  0xaa   :  { %v1350_v56 = vmul.f32 %v5429_v45, %v1323_v54  ;;  %v1347_v60 = vmul.f32 %v5432_v46, %v1322_v0  ;;  %v1349_v61 = vmul.f32 %v5435_v47, %v1320_v1 }
  0xac   :  { %v1505_v63 = vpop.permute.xlu0 %1504  ;;  %v1507_v7 = vpop.permute.xlu1 %1506  ;;  %1427 = vmatprep.subr.mxu1 %v1350_v56 }
  0xad   :  { %v1512_v8 = vsel %vm1510_vm8, %v1505_v63, %v1507_v7 }
  0xae   :  { %4876 = vmatmul.mubr.msk.f32.vlgmr.msra.gmra.mrb[0].mxu0 %vm105_vm2, %v4875_v62  ;;  %4877 = vmatmul.mubr.msk.f32.vlgmr.msra.gmra.mrb[0].mxu1 %vm105_vm2, %v4875_v62  ;;  %v1539_v11 = vmul.f32 %v5451_v59, %v1512_v8 }
  0xaf   :  { %1357 = vmatpush1.msra.mxu0 %v1347_v60  ;;  %1428 = vmatpush1.msra.mxu1 %v1349_v61 }
  0xb0   :  { %1420 = vmatprep.mubr.f32.mxu0 %v5066_v2  ;;  %1491 = vmatprep.mubr.f32.mxu1 %v5066_v2  ;;  %v1503_v26 = vpop.permute.xlu0 %1502  ;;  %v1509_v29 = vpop.permute.xlu1 %1508 }
  0xb1   :  { %v1513_v30 = vsel %vm1510_vm8, %v1503_v26, %v1505_v63  ;;  %v1511_v10 = vsel %vm1510_vm8, %v1507_v7, %v1509_v29  ;;  %v1514_v33 = vsel %vm1510_vm8, %v1509_v29, %v1503_v26  ;;  %1547 = vmatprep.subr.mxu0 %v1539_v11 }
  0xb2   :  { %v1541_v13 = vmul.f32 %v5464_v22, %v1514_v33  ;;  %v1538_v12 = vmul.f32 %v5467_v23, %v1513_v30  ;;  %v1540_v34 = vmul.f32 %v5470_v24, %v1511_v10 }
  0xb4   :  { %1618 = vmatprep.subr.mxu1 %v1541_v13 }
  0xb6   :  { %4880 = vmatmul.mubr.msk.f32.vlgmr.msra.gmra.mrb[0].mxu0 %vm105_vm2, %v4879_v35  ;;  %4881 = vmatmul.mubr.msk.f32.vlgmr.msra.gmra.mrb[0].mxu1 %vm105_vm2, %v4879_v35 }
  0xb7   :  { %1548 = vmatpush1.msra.mxu0 %v1538_v12  ;;  %1619 = vmatpush1.msra.mxu1 %v1540_v34 }
  0xb8   :  { %1611 = vmatprep.mubr.f32.mxu0 %v5066_v2  ;;  %1682 = vmatprep.mubr.f32.mxu1 %v5066_v2 }
  0xbe   :  { %4884 = vmatmul.mubr.msk.f32.vlgmr.msra.gmra.mrb[0].mxu0 %vm105_vm2, %v4883_v36  ;;  %4885 = vmatmul.mubr.msk.f32.vlgmr.msra.gmra.mrb[0].mxu1 %vm105_vm2, %v4883_v36  ;;  %v5076_v36 = vmov 1  }
  0xbf   :  { %1860 = vmatprep.mubr.f32.mxu0 %v5066_v2  ;;  %1931 = vmatprep.mubr.f32.mxu1 %v5066_v2 }
  0xc0   :  { %5051 = vset.pattern.permute.xlu0 %v5076_v36 }
  0xc1   :  { %v1697_v39 = vpop.permute.xlu0 %1696 }
 0x191   :  { %v1613_v41 = vpop.f32.mrb[0].mxu0  ;;  %v1684_v43 = vpop.f32.mrb[0].mxu1 }
 0x192   :  { %v1699_v44 = vadd.f32 %v1697_v39, %v1613_v41  ;;  %v1701_v4 = vadd.f32 %v1697_v39, %v1684_v43  ;;  %v1615_v52 = vpop.f32.mrb[1].mxu0  ;;  %v1686_v53 = vpop.f32.mrb[1].mxu1 }
 0x193   :  { %v1700_v0 = vadd.f32 %v1697_v39, %v1615_v52  ;;  %v1702_v1 = vadd.f32 %v1697_v39, %v1686_v53 }
 0x194   :  { %v1703_v54 = vmul.f32 0.01, %v1699_v44  ;;  %v1705_v56 = vmul.f32 0.01, %v1701_v4 }
 0x195   :  { %v1704_v60 = vmul.f32 0.01, %v1700_v0  ;;  %v1706_v61 = vmul.f32 0.01, %v1702_v1 }
 0x196   :  { %v1707_v62 = vmax.f32 %v1699_v44, %v1703_v54  ;;  %v1709_v63 = vmax.f32 %v1701_v4, %v1705_v56 }
 0x197   :  { %v1708_v7 = vmax.f32 %v1700_v0, %v1704_v60  ;;  %v1710_v26 = vmax.f32 %v1702_v1, %v1706_v61  ;;  %v5077_v1 = vmov 2  }
 0x198   :  { %v1716_v8 = vmul.f32 %v1707_v62, %v1707_v62  ;;  %v1718_v10 = vmul.f32 %v1709_v63, %v1709_v63  ;;  %5052 = vset.pattern.permute.xlu1 %v5077_v1 }
 0x199   :  { %v1717_v11 = vmul.f32 %v1708_v7, %v1708_v7  ;;  %v1711_v29 = vadd.f32 %v1708_v7, %v1707_v62  ;;  %v1719_v12 = vmul.f32 %v1710_v26, %v1710_v26 }
 0x19b   :  { %v1712_v30 = vadd.f32 %v1711_v29, %v1709_v63  ;;  %v1720_v33 = vadd.f32 %v1717_v11, %v1716_v8 }
 0x19d   :  { %v1713_v13 = vadd.f32 %v1712_v30, %v1710_v26  ;;  %v1721_v34 = vadd.f32 %v1720_v33, %v1718_v10 }
 0x19f   :  { %1714 = vadd.xlane.f32.xlu1 %v1713_v13  ;;  %v1722_v35 = vadd.f32 %v1721_v34, %v1719_v12 }
 0x1a1   :  { %1723 = vadd.xlane.f32.xlu0 %v1722_v35 }
 0x22c   :  { %v1715_v39 = vpop.xlane.xlu1 %1714 }
 0x22d   :  { %v1725_v41 = vmul.f32 0.001953125, %v1715_v39 }
 0x22e   :  { %v1724_v43 = vpop.xlane.xlu0 %1723 }
 0x22f   :  { %v1727_v44 = vmul.f32 %v1725_v41, %v1725_v41  ;;  %v1726_v4 = vmul.f32 0.001953125, %v1724_v43 }
 0x231   :  { %v1728_v52 = vsub.f32 %v1726_v4, %v1727_v44 }
 0x233   :  { %v1729_v53 = vmax.f32 %v1728_v52, 0.0 }
 0x235   :  { %v1730_v0 = vadd.f32 1e-05, %v1729_v53  ;;  %v4887_v53 = vld [vmem:[%s6010_s2 + $0x50] sm:$0xff] }
 0x237   :  { %5060 = vrsqrt.f32 %v1730_v0 }
 0x241   :  { %v5061_v54 = vpop.eup %5060 }
 0x242   :  { %v1732_v56 = vmul.f32 %v5061_v54, %v5193_v6 }
 0x244   :  { %1741 = vperm.xlu0 %5051, %v1732_v56   ;;  %v1733_v60 = vmul.f32 %v1732_v56, %v1725_v41 }
 0x246   :  { %1735 = vrot.lane.b32.xlu1 %v1733_v60, %s5070_s25 }
 0x248   :  { %5055 = vset.pattern.permute.xlu0 %v5077_v1 }
 0x2b8   :  { %v1736_v61 = vpop.permute.xlu1 %1735 }
 0x2b9   :  { %v1738_v8 = vsub.f32 %v5193_v6, %v1736_v61 }
 0x2bb   :  { %1750 = vperm.xlu1 %5052, %v1738_v8  }
 0x2bf   :  { %5053 = vset.pattern.permute.xlu1 %v5075_v5 }
 0x2c3   :  { %v1742_v11 = vpop.permute.xlu0 %1741 }
 0x2c4   :  { %v1744_v29 = vmul.f32 %v1742_v11, %v1707_v62  ;;  %v1746_v30 = vmul.f32 %v1742_v11, %v1709_v63  ;;  %v1745_v12 = vmul.f32 %v1742_v11, %v1708_v7  ;;  %v1747_v6 = vmul.f32 %v1742_v11, %v1710_v26  ;;  %v5579_v63 = vld [vmem:[%s6008_s3 + $0x8] sm:$0xff] }
 0x33a   :  { %v1751_v10 = vpop.permute.xlu1 %1750 }
 0x33b   :  { %v5504_v33 = vadd.f32 %v1751_v10, %v1744_v29  ;;  %v5506_v13 = vadd.f32 %v1751_v10, %v1746_v30  ;;  %v5512_v34 = vadd.f32 %v1751_v10, %v1745_v12  ;;  %v5518_v62 = vadd.f32 %v1751_v10, %v1747_v6 }
 0x33d   :  { %1761 = vrot.lane.b32.xlu0 %v5506_v13, %s5068_s24  ;;  %1775 = vrot.lane.b32.xlu1 %v5504_v33, %s5067_s19 }
 0x341   :  { %2085 = vrot.lane.b32.xlu0 %v5512_v34, %s5069_s0  ;;  %1777 = vrot.lane.b32.xlu1 %v5512_v34, %s5067_s19 }
 0x345   :  { %2087 = vrot.lane.b32.xlu0 %v5506_v13, %s5069_s0  ;;  %1781 = vrot.lane.b32.xlu1 %v5518_v62, %s5067_s19 }
 0x349   :  { %2252 = vrot.lane.b32.xlu0 %v5512_v34, %s5070_s25  ;;  %1779 = vrot.lane.b32.xlu1 %v5506_v13, %s5067_s19 }
 0x34d   :  { %2254 = vrot.lane.b32.xlu0 %v5506_v13, %s5070_s25  ;;  %1757 = vrot.lane.b32.xlu1 %v5504_v33, %s5068_s24 }
 0x351   :  { %2572 = vrot.lane.b32.xlu0 %v5506_v13, %s5071_s26  ;;  %1759 = vrot.lane.b32.xlu1 %v5512_v34, %s5068_s24 }
 0x355   :  { %2574 = vrot.lane.b32.xlu0 %v5518_v62, %s5071_s26  ;;  %1763 = vrot.lane.b32.xlu1 %v5518_v62, %s5068_s24 }
 0x359   :  { %2739 = vrot.lane.b32.xlu0 %v5506_v13, %s5072_s27  ;;  %2083 = vrot.lane.b32.xlu1 %v5504_v33, %s5069_s0 }
 0x35d   :  { %2741 = vrot.lane.b32.xlu0 %v5518_v62, %s5072_s27  ;;  %2089 = vrot.lane.b32.xlu1 %v5518_v62, %s5069_s0 }
 0x361   :  { %2906 = vrot.lane.b32.xlu0 %v5506_v13, %s5073_s28  ;;  %2250 = vrot.lane.b32.xlu1 %v5504_v33, %s5070_s25 }
 0x365   :  { %2908 = vrot.lane.b32.xlu0 %v5518_v62, %s5073_s28  ;;  %2256 = vrot.lane.b32.xlu1 %v5518_v62, %s5070_s25 }
 0x369   :  { %3073 = vrot.lane.b32.xlu0 %v5506_v13, %s5074_s29  ;;  %2570 = vrot.lane.b32.xlu1 %v5512_v34, %s5071_s26 }
 0x36d   :  { %3075 = vrot.lane.b32.xlu0 %v5518_v62, %s5074_s29  ;;  %2568 = vrot.lane.b32.xlu1 %v5504_v33, %s5071_s26 }
 0x371   :  { %2737 = vrot.lane.b32.xlu1 %v5512_v34, %s5072_s27 }
 0x375   :  { %2735 = vrot.lane.b32.xlu1 %v5504_v33, %s5072_s27 }
 0x379   :  { %2904 = vrot.lane.b32.xlu1 %v5512_v34, %s5073_s28 }
 0x37d   :  { %2902 = vrot.lane.b32.xlu1 %v5504_v33, %s5073_s28 }
 0x381   :  { %3071 = vrot.lane.b32.xlu1 %v5512_v34, %s5074_s29 }
 0x385   :  { %3069 = vrot.lane.b32.xlu1 %v5504_v33, %s5074_s29 }
 0x389   :  { %3240 = vperm.xlu1 %5053, %v5579_v63  }
 0x38d   :  { %5054 = vset.pattern.permute.xlu1 %v5076_v36 }
 0x3af   :  { %v1762_v7 = vpop.permute.xlu0 %1761  ;;  %v1776_v26 = vpop.permute.xlu1 %1775 }
 0x3b3   :  { %v1778_v35 = vpop.permute.xlu1 %1777  ;;  %v2086_v39 = vpop.permute.xlu0 %2085 }
 0x3b4   :  { %v1785_v41 = vsel %vm71_vm0, %v1776_v26, %v1778_v35 }
 0x3b5   :  { %v1788_v43 = vmul.f32 %v1785_v41, %v5214_v18 }
 0x3b7   :  { %1796 = vmatprep.subr.mxu0 %v1788_v43  ;;  %v1782_v44 = vpop.permute.xlu1 %1781  ;;  %v2088_v0 = vpop.permute.xlu0 %2087 }
 0x3b8   :  { %v1786_v4 = vsel %vm71_vm0, %v1782_v44, %v1776_v26 }
 0x3b9   :  { %v1787_v52 = vmul.f32 %v1786_v4, %v5220_v20 }
 0x3bb   :  { %1797 = vmatpush1.msra.mxu0 %v1787_v52  ;;  %v1780_v54 = vpop.permute.xlu1 %1779  ;;  %v2253_v29 = vpop.permute.xlu0 %2252  ;;  %v4886_v52 = vld [vmem:[%s6010_s2 + $0x48] sm:$0xff] }
 0x3bc   :  { %v1783_v56 = vsel %vm71_vm0, %v1780_v54, %v1782_v44  ;;  %v1784_v60 = vsel %vm71_vm0, %v1778_v35, %v1780_v54  ;;  %4888 = vmatmul.mubr.msk.f32.vlgmr.msra.gmra.mrb[2].mxu0 %vm105_vm2, %v4887_v53 }
 0x3bd   :  { %v1789_v61 = vmul.f32 %v1784_v60, %v5217_v19  ;;  %v1790_v8 = vmul.f32 %v1783_v56, %v5211_v17  ;;  %2005 = vmatprep.mubr.f32.mxu0 %v5066_v2 }
 0x3bf   :  { %1867 = vmatprep.subr.mxu1 %v1790_v8  ;;  %v1758_v11 = vpop.permute.xlu1 %1757  ;;  %v2255_v6 = vpop.permute.xlu0 %2254 }
 0x3c0   :  { %1868 = vmatpush1.msra.mxu1 %v1789_v61  ;;  %v2092_v61 = vsel %vm404_vm3, %v2086_v39, %v2088_v0 }
 0x3c1   :  { %4889 = vmatmul.mubr.msk.f32.vlgmr.msra.gmra.mrb[2].mxu1 %vm105_vm2, %v4887_v53 }
 0x3c2   :  { %2076 = vmatprep.mubr.f32.mxu1 %v5066_v2 }
 0x3c3   :  { %v1760_v30 = vpop.permute.xlu1 %1759  ;;  %v2573_v56 = vpop.permute.xlu0 %2572 }
 0x3c4   :  { %v1767_v10 = vsel %vm31_vm1, %v1758_v11, %v1760_v30  ;;  %v1766_v26 = vsel %vm31_vm1, %v1760_v30, %v1762_v7 }
 0x3c5   :  { %v1770_v12 = vmul.f32 %v1767_v10, %v5238_v31  ;;  %v1771_v53 = vmul.f32 %v1766_v26, %v5247_v37  ;;  %v4892_v26 = vld [vmem:[%s6010_s2 + $0x58] sm:$0xff] }
 0x3c7   :  { %1941 = vmatprep.subr.mxu0 %v1770_v12  ;;  %v1764_v35 = vpop.permute.xlu1 %1763 }
 0x3c8   :  { %v1765_v41 = vsel %vm31_vm1, %v1762_v7, %v1764_v35  ;;  %v1768_v43 = vsel %vm31_vm1, %v1764_v35, %v1758_v11  ;;  %v2097_v35 = vmul.f32 %v2092_v61, %v5282_v55  ;;  %v4895_v61 = vld [vmem:[%s6010_s2 + $0x60] sm:$0xff] }
 0x3c9   :  { %v1769_v44 = vmul.f32 %v1768_v43, %v5252_v38  ;;  %v1772_v4 = vmul.f32 %v1765_v41, %v5256_v40  ;;  %v2575_v41 = vpop.permute.xlu0 %2574 }
 0x3cb   :  { %1942 = vmatpush1.msra.mxu0 %v1769_v44  ;;  %2012 = vmatprep.subr.mxu1 %v1772_v4  ;;  %v2084_v54 = vpop.permute.xlu1 %2083  ;;  %v2259_v44 = vsel %vm595_vm4, %v2253_v29, %v2255_v6 }
 0x3cc   :  { %v2093_v7 = vsel %vm404_vm3, %v2084_v54, %v2086_v39  ;;  %4890 = vmatmul.mubr.msk.f32.vlgmr.msra.gmra.mrb[2].mxu0 %vm105_vm2, %v4886_v52  ;;  %2013 = vmatpush1.msra.mxu1 %v1771_v53 }
 0x3cd   :  { %v2096_v60 = vmul.f32 %v2093_v7, %v5274_v50  ;;  %4891 = vmatmul.mubr.msk.f32.vlgmr.msra.gmra.mrb[2].mxu1 %vm105_vm2, %v4886_v52  ;;  %2168 = vmatprep.mubr.f32.mxu0 %v5066_v2  ;;  %v2740_v52 = vpop.permute.xlu0 %2739 }
 0x3ce   :  { %2239 = vmatprep.mubr.f32.mxu1 %v5066_v2 }
 0x3cf   :  { %2104 = vmatprep.subr.mxu0 %v2096_v60  ;;  %v2090_v8 = vpop.permute.xlu1 %2089 }
 0x3d0   :  { %v2091_v11 = vsel %vm404_vm3, %v2088_v0, %v2090_v8  ;;  %v2094_v30 = vsel %vm404_vm3, %v2090_v8, %v2084_v54  ;;  %v2264_v8 = vmul.f32 %v2259_v44, %v5317_v25 }
 0x3d1   :  { %v2095_v10 = vmul.f32 %v2094_v30, %v5288_v57  ;;  %v2098_v12 = vmul.f32 %v2091_v11, %v5291_v58  ;;  %v2742_v30 = vpop.permute.xlu0 %2741 }
 0x3d3   :  { %2105 = vmatpush1.msra.mxu0 %v2095_v10  ;;  %2175 = vmatprep.subr.mxu1 %v2098_v12  ;;  %v2251_v39 = vpop.permute.xlu1 %2250 }
 0x3d4   :  { %v2260_v0 = vsel %vm595_vm4, %v2251_v39, %v2253_v29  ;;  %4893 = vmatmul.mubr.msk.f32.vlgmr.msra.gmra.mrb[2].mxu0 %vm105_vm2, %v4892_v26  ;;  %2176 = vmatpush1.msra.mxu1 %v2097_v35 }
 0x3d5   :  { %v2263_v43 = vmul.f32 %v2260_v0, %v5309_v16  ;;  %4894 = vmatmul.mubr.msk.f32.vlgmr.msra.gmra.mrb[2].mxu1 %vm105_vm2, %v4892_v26  ;;  %2335 = vmatprep.mubr.f32.mxu0 %v5066_v2  ;;  %v2907_v0 = vpop.permute.xlu0 %2906 }
 0x3d6   :  { %2406 = vmatprep.mubr.f32.mxu1 %v5066_v2 }
 0x3d7   :  { %2271 = vmatprep.subr.mxu0 %v2263_v43  ;;  %v2257_v4 = vpop.permute.xlu1 %2256 }
 0x3d8   :  { %v2258_v53 = vsel %vm595_vm4, %v2255_v6, %v2257_v4  ;;  %v2261_v54 = vsel %vm595_vm4, %v2257_v4, %v2251_v39 }
 0x3d9   :  { %v2262_v7 = vmul.f32 %v2261_v54, %v5323_v27  ;;  %v2265_v60 = vmul.f32 %v2258_v53, %v5326_v28  ;;  %v2743_v53 = vsel %vm1128_vm6, %v2740_v52, %v2742_v30 }
 0x3db   :  { %2272 = vmatpush1.msra.mxu0 %v2262_v7  ;;  %2342 = vmatprep.subr.mxu1 %v2265_v60  ;;  %v2571_v29 = vpop.permute.xlu1 %2570  ;;  %v4901_v60 = vld [vmem:[%s6010_s2 + $0x70] sm:$0xff] }
 0x3dc   :  { %v2577_v11 = vsel %vm937_vm5, %v2571_v29, %v2573_v56  ;;  %4896 = vmatmul.mubr.msk.f32.vlgmr.msra.gmra.mrb[2].mxu0 %vm105_vm2, %v4895_v61  ;;  %2343 = vmatpush1.msra.mxu1 %v2264_v8 }
 0x3dd   :  { %v2581_v6 = vmul.f32 %v2577_v11, %v5344_v42  ;;  %2422 = vmatprep.subr.mxu0 %v5512_v34  ;;  %4897 = vmatmul.mubr.msk.f32.vlgmr.msra.gmra.mrb[2].mxu1 %vm105_vm2, %v4895_v61  ;;  %v2576_v34 = vsel %vm937_vm5, %v2573_v56, %v2575_v41  ;;  %v2909_v61 = vpop.permute.xlu0 %2908 }
 0x3de   :  { %2423 = vmatpush1.msra.mxu0 %v5504_v33  ;;  %2493 = vmatprep.subr.mxu1 %v5518_v62  ;;  %v2582_v39 = vmul.f32 %v2576_v34, %v5364_v51 }
 0x3df   :  { %2494 = vmatpush1.msra.mxu1 %v5506_v13  ;;  %2589 = vmatprep.subr.mxu0 %v2581_v6  ;;  %v2569_v10 = vpop.permute.xlu1 %2568  ;;  %v4898_v13 = vld [vmem:[%s6010_s2 + $0x68] sm:$0xff] }
 0x3e0   :  { %v2578_v12 = vsel %vm937_vm5, %v2569_v10, %v2571_v29  ;;  %v2579_v26 = vsel %vm937_vm5, %v2575_v41, %v2569_v10  ;;  %2486 = vmatprep.mubr.f32.mxu0 %v5066_v2  ;;  %2557 = vmatprep.mubr.f32.mxu1 %v5066_v2  ;;  %v2749_v29 = vmul.f32 %v2743_v53, %v5400_v21 }
 0x3e1   :  { %v2580_v33 = vmul.f32 %v2578_v12, %v5361_v49  ;;  %v2583_v62 = vmul.f32 %v2579_v26, %v5356_v48  ;;  %v2910_v26 = vsel %vm1319_vm7, %v2907_v0, %v2909_v61 }
 0x3e3   :  { %2660 = vmatprep.subr.mxu1 %v2583_v62  ;;  %v2738_v35 = vpop.permute.xlu1 %2737  ;;  %v4904_v62 = vld [vmem:[%s6010_s2 + $0x78] sm:$0xff] }
 0x3e4   :  { %v2744_v43 = vsel %vm1128_vm6, %v2738_v35, %v2740_v52  ;;  %4899 = vmatmul.mubr.msk.f32.vlgmr.msra.gmra.mrb[2].mxu0 %vm105_vm2, %v4898_v13 }
 0x3e5   :  { %v2748_v56 = vmul.f32 %v2744_v43, %v5381_v3  ;;  %2590 = vmatpush1.msra.mxu0 %v2580_v33  ;;  %4900 = vmatmul.mubr.msk.f32.vlgmr.msra.gmra.mrb[2].mxu1 %vm105_vm2, %v4898_v13 }
 0x3e6   :  { %2661 = vmatpush1.msra.mxu1 %v2582_v39  ;;  %2653 = vmatprep.mubr.f32.mxu0 %v5066_v2 }
 0x3e7   :  { %2756 = vmatprep.subr.mxu0 %v2748_v56  ;;  %v2736_v41 = vpop.permute.xlu1 %2735  ;;  %2724 = vmatprep.mubr.f32.mxu1 %v5066_v2 }
 0x3e8   :  { %v2745_v44 = vsel %vm1128_vm6, %v2736_v41, %v2738_v35  ;;  %v2746_v4 = vsel %vm1128_vm6, %v2742_v30, %v2736_v41  ;;  %v3074_v30 = vpop.permute.xlu0 %3073  ;;  %v2916_v35 = vmul.f32 %v2910_v26, %v5435_v47 }
 0x3e9   :  { %v2747_v54 = vmul.f32 %v2745_v44, %v5397_v15  ;;  %v2750_v7 = vmul.f32 %v2746_v4, %v5394_v14 }
 0x3eb   :  { %2827 = vmatprep.subr.mxu1 %v2750_v7  ;;  %v2905_v8 = vpop.permute.xlu1 %2904  ;;  %v4907_v7 = vld [vmem:[%s6010_s2 + $0x80] sm:$0xff] }
 0x3ec   :  { %v2911_v11 = vsel %vm1319_vm7, %v2905_v8, %v2907_v0  ;;  %4902 = vmatmul.mubr.msk.f32.vlgmr.msra.gmra.mrb[2].mxu0 %vm105_vm2, %v4901_v60  ;;  %v3076_v0 = vpop.permute.xlu0 %3075 }
 0x3ed   :  { %v2915_v52 = vmul.f32 %v2911_v11, %v5415_v32  ;;  %2757 = vmatpush1.msra.mxu0 %v2747_v54  ;;  %4903 = vmatmul.mubr.msk.f32.vlgmr.msra.gmra.mrb[2].mxu1 %vm105_vm2, %v4901_v60  ;;  %v3077_v4 = vsel %vm1510_vm8, %v3074_v30, %v3076_v0 }
 0x3ee   :  { %2828 = vmatpush1.msra.mxu1 %v2749_v29  ;;  %2820 = vmatprep.mubr.f32.mxu0 %v5066_v2  ;;  %v3083_v60 = vmul.f32 %v3077_v4, %v5470_v24 }
 0x3ef   :  { %2923 = vmatprep.subr.mxu0 %v2915_v52  ;;  %v2903_v6 = vpop.permute.xlu1 %2902  ;;  %2891 = vmatprep.mubr.f32.mxu1 %v5066_v2 }
 0x3f0   :  { %v2912_v10 = vsel %vm1319_vm7, %v2903_v6, %v2905_v8  ;;  %v2913_v12 = vsel %vm1319_vm7, %v2909_v61, %v2903_v6  ;;  %v4910_v61 = vld [vmem:[%s6010_s2 + $0x88] sm:$0xff] }
 0x3f1   :  { %v2914_v34 = vmul.f32 %v2912_v10, %v5432_v46  ;;  %v2917_v33 = vmul.f32 %v2913_v12, %v5429_v45 }
 0x3f3   :  { %2994 = vmatprep.subr.mxu1 %v2917_v33  ;;  %v3072_v13 = vpop.permute.xlu1 %3071 }
 0x3f4   :  { %v3078_v39 = vsel %vm1510_vm8, %v3072_v13, %v3074_v30  ;;  %4905 = vmatmul.mubr.msk.f32.vlgmr.msra.gmra.mrb[2].mxu0 %vm105_vm2, %v4904_v62 }
 0x3f5   :  { %v3082_v43 = vmul.f32 %v3078_v39, %v5451_v59  ;;  %2924 = vmatpush1.msra.mxu0 %v2914_v34  ;;  %4906 = vmatmul.mubr.msk.f32.vlgmr.msra.gmra.mrb[2].mxu1 %vm105_vm2, %v4904_v62 }
 0x3f6   :  { %2995 = vmatpush1.msra.mxu1 %v2916_v35  ;;  %2987 = vmatprep.mubr.f32.mxu0 %v5066_v2 }
 0x3f7   :  { %3090 = vmatprep.subr.mxu0 %v3082_v43  ;;  %v3070_v56 = vpop.permute.xlu1 %3069  ;;  %3058 = vmatprep.mubr.f32.mxu1 %v5066_v2 }
 0x3f8   :  { %v3079_v41 = vsel %vm1510_vm8, %v3070_v56, %v3072_v13  ;;  %v3080_v44 = vsel %vm1510_vm8, %v3076_v0, %v3070_v56 }
 0x3f9   :  { %v3081_v53 = vmul.f32 %v3079_v41, %v5467_v23  ;;  %v3084_v54 = vmul.f32 %v3080_v44, %v5464_v22 }
 0x3fb   :  { %3161 = vmatprep.subr.mxu1 %v3084_v54 }
 0x3fc   :  { %4908 = vmatmul.mubr.msk.f32.vlgmr.msra.gmra.mrb[2].mxu0 %vm105_vm2, %v4907_v7 }
 0x3fd   :  { %3091 = vmatpush1.msra.mxu0 %v3081_v53  ;;  %4909 = vmatmul.mubr.msk.f32.vlgmr.msra.gmra.mrb[2].mxu1 %vm105_vm2, %v4907_v7 }
 0x3fe   :  { %3162 = vmatpush1.msra.mxu1 %v3083_v60  ;;  %3154 = vmatprep.mubr.f32.mxu0 %v5066_v2 }
 0x3ff   :  { %3225 = vmatprep.mubr.f32.mxu1 %v5066_v2 }
 0x404   :  { %4911 = vmatmul.mubr.msk.f32.vlgmr.msra.gmra.mrb[2].mxu0 %vm105_vm2, %v4910_v61 }
 0x405   :  { %4912 = vmatmul.mubr.msk.f32.vlgmr.msra.gmra.mrb[2].mxu1 %vm105_vm2, %v4910_v61  ;;  %3404 = vmatprep.mubr.f32.mxu0 %v5066_v2 }
 0x406   :  { %3475 = vmatprep.mubr.f32.mxu1 %v5066_v2 }
 0x408   :  { %v3241_v8 = vpop.permute.xlu1 %3240 }
 0x4d7   :  { %v3156_v29 = vpop.f32.mrb[2].mxu0 }
 0x4d8   :  { %v3243_v11 = vadd.f32 %v3241_v8, %v3156_v29  ;;  %v3158_v52 = vpop.f32.mrb[3].mxu0  ;;  %v3227_v6 = vpop.f32.mrb[2].mxu1 }
 0x4d9   :  { %v3244_v30 = vadd.f32 %v3241_v8, %v3158_v52  ;;  %v3245_v10 = vadd.f32 %v3241_v8, %v3227_v6  ;;  %v3229_v12 = vpop.f32.mrb[3].mxu1 }
 0x4da   :  { %v3247_v26 = vmul.f32 0.01, %v3243_v11  ;;  %v3246_v34 = vadd.f32 %v3241_v8, %v3229_v12 }
 0x4db   :  { %v3248_v33 = vmul.f32 0.01, %v3244_v30  ;;  %v3249_v62 = vmul.f32 0.01, %v3245_v10 }
 0x4dc   :  { %v3251_v13 = vmax.f32 %v3243_v11, %v3247_v26  ;;  %v3250_v35 = vmul.f32 0.01, %v3246_v34 }
 0x4dd   :  { %v3252_v39 = vmax.f32 %v3244_v30, %v3248_v33  ;;  %v3253_v43 = vmax.f32 %v3245_v10, %v3249_v62 }
 0x4de   :  { %v3260_v0 = vmul.f32 %v3251_v13, %v3251_v13  ;;  %v3254_v41 = vmax.f32 %v3246_v34, %v3250_v35 }
 0x4df   :  { %v3261_v56 = vmul.f32 %v3252_v39, %v3252_v39  ;;  %v3255_v44 = vadd.f32 %v3252_v39, %v3251_v13  ;;  %v3262_v53 = vmul.f32 %v3253_v43, %v3253_v43 }
 0x4e0   :  { %v3263_v60 = vmul.f32 %v3254_v41, %v3254_v41 }
 0x4e1   :  { %v3256_v4 = vadd.f32 %v3255_v44, %v3253_v43  ;;  %v3264_v54 = vadd.f32 %v3261_v56, %v3260_v0 }
 0x4e3   :  { %v3257_v7 = vadd.f32 %v3256_v4, %v3254_v41  ;;  %v3265_v61 = vadd.f32 %v3264_v54, %v3262_v53 }
 0x4e5   :  { %3258 = vadd.xlane.f32.xlu0 %v3257_v7  ;;  %v3266_v29 = vadd.f32 %v3265_v61, %v3263_v60 }
 0x4e7   :  { %3267 = vadd.xlane.f32.xlu1 %v3266_v29 }
 0x572   :  { %v3259_v8 = vpop.xlane.xlu0 %3258 }
 0x573   :  { %v3269_v52 = vmul.f32 0.001953125, %v3259_v8 }
 0x574   :  { %v3268_v6 = vpop.xlane.xlu1 %3267 }
 0x575   :  { %v3271_v11 = vmul.f32 %v3269_v52, %v3269_v52  ;;  %v3270_v12 = vmul.f32 0.001953125, %v3268_v6 }
 0x577   :  { %v3272_v30 = vsub.f32 %v3270_v12, %v3271_v11  ;;  %v4915_v12 = vld [vmem:[%s6010_s2 + $0x98] sm:$0xff] }
 0x579   :  { %v3273_v10 = vmax.f32 %v3272_v30, 0.0 }
 0x57b   :  { %v3274_v26 = vadd.f32 1e-05, %v3273_v10 }
 0x57d   :  { %5062 = vrsqrt.f32 %v3274_v26 }
 0x587   :  { %v5063_v34 = vpop.eup %5062 }
 0x588   :  { %v3276_v33 = vmul.f32 %v5063_v34, %v5579_v63 }
 0x58a   :  { %3285 = vperm.xlu1 %5054, %v3276_v33   ;;  %v3277_v62 = vmul.f32 %v3276_v33, %v3269_v52 }
 0x58c   :  { %3279 = vrot.lane.b32.xlu0 %v3277_v62, %s5070_s25 }
 0x58e   :  { %5058 = vset.pattern.permute.xlu1 %v5077_v1 }
 0x5fe   :  { %v3280_v35 = vpop.permute.xlu0 %3279 }
 0x5ff   :  { %v3282_v0 = vsub.f32 %v5579_v63, %v3280_v35 }
 0x601   :  { %3294 = vperm.xlu0 %5055, %v3282_v0  }
 0x605   :  { %5056 = vset.pattern.permute.xlu0 %v5075_v5 }
 0x609   :  { %v3286_v56 = vpop.permute.xlu1 %3285 }
 0x60a   :  { %v3288_v44 = vmul.f32 %v3286_v56, %v3251_v13  ;;  %v3291_v4 = vmul.f32 %v3286_v56, %v3254_v41  ;;  %v3289_v60 = vmul.f32 %v3286_v56, %v3252_v39  ;;  %v3290_v63 = vmul.f32 %v3286_v56, %v3253_v43  ;;  %v5826_v13 = vld [vmem:[%s6008_s3 + $0x10] sm:$0xff] }
 0x680   :  { %v3295_v53 = vpop.permute.xlu0 %3294 }
 0x681   :  { %v5751_v54 = vadd.f32 %v3295_v53, %v3288_v44  ;;  %v5753_v7 = vadd.f32 %v3295_v53, %v3291_v4  ;;  %v5759_v61 = vadd.f32 %v3295_v53, %v3289_v60  ;;  %v5765_v5 = vadd.f32 %v3295_v53, %v3290_v63 }
 0x683   :  { %3325 = vrot.lane.b32.xlu0 %v5753_v7, %s5067_s19  ;;  %3319 = vrot.lane.b32.xlu1 %v5751_v54, %s5067_s19 }
 0x687   :  { %3301 = vrot.lane.b32.xlu0 %v5751_v54, %s5068_s24  ;;  %3321 = vrot.lane.b32.xlu1 %v5759_v61, %s5067_s19 }
 0x68b   :  { %3307 = vrot.lane.b32.xlu0 %v5753_v7, %s5068_s24  ;;  %3323 = vrot.lane.b32.xlu1 %v5765_v5, %s5067_s19 }
 0x68f   :  { %3627 = vrot.lane.b32.xlu0 %v5751_v54, %s5069_s0  ;;  %3303 = vrot.lane.b32.xlu1 %v5759_v61, %s5068_s24 }
 0x693   :  { %3633 = vrot.lane.b32.xlu0 %v5753_v7, %s5069_s0  ;;  %3305 = vrot.lane.b32.xlu1 %v5765_v5, %s5068_s24 }
 0x697   :  { %3794 = vrot.lane.b32.xlu0 %v5751_v54, %s5070_s25  ;;  %3629 = vrot.lane.b32.xlu1 %v5759_v61, %s5069_s0 }
 0x69b   :  { %3800 = vrot.lane.b32.xlu0 %v5753_v7, %s5070_s25  ;;  %3631 = vrot.lane.b32.xlu1 %v5765_v5, %s5069_s0 }
 0x69f   :  { %4114 = vrot.lane.b32.xlu0 %v5759_v61, %s5071_s26  ;;  %3796 = vrot.lane.b32.xlu1 %v5759_v61, %s5070_s25 }
 0x6a3   :  { %4112 = vrot.lane.b32.xlu0 %v5751_v54, %s5071_s26  ;;  %3798 = vrot.lane.b32.xlu1 %v5765_v5, %s5070_s25 }
 0x6a7   :  { %4281 = vrot.lane.b32.xlu0 %v5759_v61, %s5072_s27  ;;  %4116 = vrot.lane.b32.xlu1 %v5765_v5, %s5071_s26 }
 0x6ab   :  { %4279 = vrot.lane.b32.xlu0 %v5751_v54, %s5072_s27  ;;  %4118 = vrot.lane.b32.xlu1 %v5753_v7, %s5071_s26 }
 0x6af   :  { %4448 = vrot.lane.b32.xlu0 %v5759_v61, %s5073_s28  ;;  %4283 = vrot.lane.b32.xlu1 %v5765_v5, %s5072_s27 }
 0x6b3   :  { %4446 = vrot.lane.b32.xlu0 %v5751_v54, %s5073_s28  ;;  %4285 = vrot.lane.b32.xlu1 %v5753_v7, %s5072_s27 }
 0x6b7   :  { %4615 = vrot.lane.b32.xlu0 %v5759_v61, %s5074_s29  ;;  %4450 = vrot.lane.b32.xlu1 %v5765_v5, %s5073_s28 }
 0x6bb   :  { %4613 = vrot.lane.b32.xlu0 %v5751_v54, %s5074_s29  ;;  %4452 = vrot.lane.b32.xlu1 %v5753_v7, %s5073_s28 }
 0x6bf   :  { %4617 = vrot.lane.b32.xlu1 %v5765_v5, %s5074_s29  ;;  %4784 = vperm.xlu0 %5056, %v5826_v13  }
 0x6c3   :  { %4619 = vrot.lane.b32.xlu1 %v5753_v7, %s5074_s29  ;;  %5057 = vset.pattern.permute.xlu0 %v5076_v36 }
 0x6f5   :  { %v3326_v39 = vpop.permute.xlu0 %3325  ;;  %v3320_v43 = vpop.permute.xlu1 %3319 }
 0x6f6   :  { %v3330_v41 = vsel %vm71_vm0, %v3326_v39, %v3320_v43 }
 0x6f7   :  { %v3331_v11 = vmul.f32 %v3330_v41, %v5220_v20 }
 0x6f9   :  { %v3302_v29 = vpop.permute.xlu0 %3301  ;;  %v3322_v8 = vpop.permute.xlu1 %3321 }
 0x6fa   :  { %v3329_v52 = vsel %vm71_vm0, %v3320_v43, %v3322_v8 }
 0x6fb   :  { %v3332_v6 = vmul.f32 %v3329_v52, %v5214_v18 }
 0x6fd   :  { %v3308_v30 = vpop.permute.xlu0 %3307  ;;  %3340 = vmatprep.subr.mxu0 %v3332_v6  ;;  %v3324_v36 = vpop.permute.xlu1 %3323 }
 0x6fe   :  { %v3327_v10 = vsel %vm71_vm0, %v3324_v36, %v3326_v39  ;;  %v3328_v26 = vsel %vm71_vm0, %v3322_v8, %v3324_v36  ;;  %3341 = vmatpush1.msra.mxu0 %v3331_v11  ;;  %v3312_v20 = vsel %vm31_vm1, %v3308_v30, %v3302_v29 }
 0x6ff   :  { %v3333_v34 = vmul.f32 %v3328_v26, %v5217_v19  ;;  %v3334_v18 = vmul.f32 %v3327_v10, %v5211_v17  ;;  %4916 = vmatmul.mubr.msk.f32.vlgmr.msra.gmra.mrb[4].mxu0 %vm105_vm2, %v4915_v12  ;;  %v3313_v17 = vmul.f32 %v3312_v20, %v5252_v38  ;;  %v4914_v19 = vld [vmem:[%s6010_s2 + $0x90] sm:$0xff] }
 0x700   :  { %3549 = vmatprep.mubr.f32.mxu0 %v5066_v2 }
 0x701   :  { %v3628_v33 = vpop.permute.xlu0 %3627  ;;  %3411 = vmatprep.subr.mxu1 %v3334_v18  ;;  %v3304_v62 = vpop.permute.xlu1 %3303 }
 0x702   :  { %v3311_v35 = vsel %vm31_vm1, %v3302_v29, %v3304_v62  ;;  %3412 = vmatpush1.msra.mxu1 %v3333_v34 }
 0x703   :  { %v3314_v0 = vmul.f32 %v3311_v35, %v5238_v31  ;;  %4917 = vmatmul.mubr.msk.f32.vlgmr.msra.gmra.mrb[4].mxu1 %vm105_vm2, %v4915_v12 }
 0x704   :  { %3620 = vmatprep.mubr.f32.mxu1 %v5066_v2 }
 0x705   :  { %v3634_v56 = vpop.permute.xlu0 %3633  ;;  %3485 = vmatprep.subr.mxu0 %v3314_v0  ;;  %v3306_v44 = vpop.permute.xlu1 %3305 }
 0x706   :  { %v3309_v4 = vsel %vm31_vm1, %v3306_v44, %v3308_v30  ;;  %v3310_v53 = vsel %vm31_vm1, %v3304_v62, %v3306_v44  ;;  %3486 = vmatpush1.msra.mxu0 %v3313_v17  ;;  %v3638_v60 = vsel %vm404_vm3, %v3634_v56, %v3628_v33 }
 0x707   :  { %v3315_v31 = vmul.f32 %v3310_v53, %v5247_v37  ;;  %v3316_v38 = vmul.f32 %v3309_v4, %v5256_v40  ;;  %4918 = vmatmul.mubr.msk.f32.vlgmr.msra.gmra.mrb[4].mxu0 %vm105_vm2, %v4914_v19  ;;  %v3639_v37 = vmul.f32 %v3638_v60, %v5288_v57  ;;  %v4920_v40 = vld [vmem:[%s6010_s2 + $0xa0] sm:$0xff] }
 0x708   :  { %3712 = vmatprep.mubr.f32.mxu0 %v5066_v2 }
 0x709   :  { %v3795_v63 = vpop.permute.xlu0 %3794  ;;  %3556 = vmatprep.subr.mxu1 %v3316_v38  ;;  %v3630_v39 = vpop.permute.xlu1 %3629 }
 0x70a   :  { %v3637_v43 = vsel %vm404_vm3, %v3628_v33, %v3630_v39  ;;  %3557 = vmatpush1.msra.mxu1 %v3315_v31 }
 0x70b   :  { %v3640_v41 = vmul.f32 %v3637_v43, %v5274_v50  ;;  %4919 = vmatmul.mubr.msk.f32.vlgmr.msra.gmra.mrb[4].mxu1 %vm105_vm2, %v4914_v19 }
 0x70c   :  { %3783 = vmatprep.mubr.f32.mxu1 %v5066_v2 }
 0x70d   :  { %v3801_v29 = vpop.permute.xlu0 %3800  ;;  %3648 = vmatprep.subr.mxu0 %v3640_v41  ;;  %v3632_v8 = vpop.permute.xlu1 %3631 }
 0x70e   :  { %v3635_v52 = vsel %vm404_vm3, %v3632_v8, %v3634_v56  ;;  %v3636_v6 = vsel %vm404_vm3, %v3630_v39, %v3632_v8  ;;  %3649 = vmatpush1.msra.mxu0 %v3639_v37  ;;  %v3805_v11 = vsel %vm595_vm4, %v3801_v29, %v3795_v63 }
 0x70f   :  { %v3641_v50 = vmul.f32 %v3636_v6, %v5282_v55  ;;  %v3642_v57 = vmul.f32 %v3635_v52, %v5291_v58  ;;  %4921 = vmatmul.mubr.msk.f32.vlgmr.msra.gmra.mrb[4].mxu0 %vm105_vm2, %v4920_v40  ;;  %v3806_v55 = vmul.f32 %v3805_v11, %v5323_v27  ;;  %v4923_v58 = vld [vmem:[%s6010_s2 + $0xa8] sm:$0xff] }
 0x710   :  { %3879 = vmatprep.mubr.f32.mxu0 %v5066_v2 }
 0x711   :  { %v4115_v12 = vpop.permute.xlu0 %4114  ;;  %3719 = vmatprep.subr.mxu1 %v3642_v57  ;;  %v3797_v30 = vpop.permute.xlu1 %3796 }
 0x712   :  { %v3804_v36 = vsel %vm595_vm4, %v3795_v63, %v3797_v30  ;;  %3720 = vmatpush1.msra.mxu1 %v3641_v50 }
 0x713   :  { %v3807_v10 = vmul.f32 %v3804_v36, %v5309_v16  ;;  %4922 = vmatmul.mubr.msk.f32.vlgmr.msra.gmra.mrb[4].mxu1 %vm105_vm2, %v4920_v40 }
 0x714   :  { %3950 = vmatprep.mubr.f32.mxu1 %v5066_v2 }
 0x715   :  { %v4113_v26 = vpop.permute.xlu0 %4112  ;;  %3815 = vmatprep.subr.mxu0 %v3807_v10  ;;  %v3799_v34 = vpop.permute.xlu1 %3798 }
 0x716   :  { %v3802_v18 = vsel %vm595_vm4, %v3799_v34, %v3801_v29  ;;  %v3803_v20 = vsel %vm595_vm4, %v3797_v30, %v3799_v34  ;;  %3816 = vmatpush1.msra.mxu0 %v3806_v55 }
 0x717   :  { %v3808_v16 = vmul.f32 %v3803_v20, %v5317_v25  ;;  %v3809_v27 = vmul.f32 %v3802_v18, %v5326_v28  ;;  %4924 = vmatmul.mubr.msk.f32.vlgmr.msra.gmra.mrb[4].mxu0 %vm105_vm2, %v4923_v58  ;;  %3966 = vmatprep.subr.mxu0 %v5759_v61  ;;  %v4122_v25 = vsel %vm937_vm5, %v4113_v26, %v4115_v12 }
 0x718   :  { %3967 = vmatpush1.msra.mxu0 %v5751_v54  ;;  %4030 = vmatprep.mubr.f32.mxu0 %v5066_v2  ;;  %v4926_v54 = vld [vmem:[%s6010_s2 + $0xb0] sm:$0xff]  ;;  %v4124_v17 = vmul.f32 %v4122_v25, %v5361_v49 }
 0x719   :  { %v4282_v33 = vpop.permute.xlu0 %4281  ;;  %3886 = vmatprep.subr.mxu1 %v3809_v27  ;;  %v4117_v62 = vpop.permute.xlu1 %4116 }
 0x71a   :  { %v4121_v35 = vsel %vm937_vm5, %v4115_v12, %v4117_v62  ;;  %3887 = vmatpush1.msra.mxu1 %v3808_v16 }
 0x71b   :  { %v4125_v28 = vmul.f32 %v4121_v35, %v5344_v42  ;;  %4925 = vmatmul.mubr.msk.f32.vlgmr.msra.gmra.mrb[4].mxu1 %vm105_vm2, %v4923_v58  ;;  %4037 = vmatprep.subr.mxu1 %v5753_v7 }
 0x71c   :  { %4038 = vmatpush1.msra.mxu1 %v5765_v5  ;;  %4101 = vmatprep.mubr.f32.mxu1 %v5066_v2 }
 0x71d   :  { %v4280_v61 = vpop.permute.xlu0 %4279  ;;  %4133 = vmatprep.subr.mxu0 %v4125_v28  ;;  %v4119_v0 = vpop.permute.xlu1 %4118 }
 0x71e   :  { %v4123_v42 = vsel %vm937_vm5, %v4119_v0, %v4113_v26  ;;  %v4120_v19 = vsel %vm937_vm5, %v4117_v62, %v4119_v0  ;;  %v4289_v4 = vsel %vm1128_vm6, %v4280_v61, %v4282_v33 }
 0x71f   :  { %v4127_v7 = vmul.f32 %v4123_v42, %v5356_v48  ;;  %4927 = vmatmul.mubr.msk.f32.vlgmr.msra.gmra.mrb[4].mxu0 %vm105_vm2, %v4926_v54  ;;  %v4126_v44 = vmul.f32 %v4120_v19, %v5364_v51  ;;  %v4929_v48 = vld [vmem:[%s6010_s2 + $0xb8] sm:$0xff]  ;;  %v4291_v38 = vmul.f32 %v4289_v4, %v5397_v15 }
 0x720   :  { %4134 = vmatpush1.msra.mxu0 %v4124_v17  ;;  %4197 = vmatprep.mubr.f32.mxu0 %v5066_v2 }
 0x721   :  { %v4449_v5 = vpop.permute.xlu0 %4448  ;;  %4204 = vmatprep.subr.mxu1 %v4127_v7  ;;  %v4284_v56 = vpop.permute.xlu1 %4283 }
 0x722   :  { %v4288_v49 = vsel %vm1128_vm6, %v4282_v33, %v4284_v56 }
 0x723   :  { %v4292_v53 = vmul.f32 %v4288_v49, %v5381_v3  ;;  %4928 = vmatmul.mubr.msk.f32.vlgmr.msra.gmra.mrb[4].mxu1 %vm105_vm2, %v4926_v54 }
 0x724   :  { %4205 = vmatpush1.msra.mxu1 %v4126_v44  ;;  %4268 = vmatprep.mubr.f32.mxu1 %v5066_v2 }
 0x725   :  { %v4447_v31 = vpop.permute.xlu0 %4446  ;;  %4300 = vmatprep.subr.mxu0 %v4292_v53  ;;  %v4286_v51 = vpop.permute.xlu1 %4285 }
 0x726   :  { %v4290_v60 = vsel %vm1128_vm6, %v4286_v51, %v4280_v61  ;;  %v4287_v3 = vsel %vm1128_vm6, %v4284_v56, %v4286_v51  ;;  %v4456_v37 = vsel %vm1319_vm7, %v4447_v31, %v4449_v5 }
 0x727   :  { %v4294_v63 = vmul.f32 %v4290_v60, %v5394_v14  ;;  %4930 = vmatmul.mubr.msk.f32.vlgmr.msra.gmra.mrb[4].mxu0 %vm105_vm2, %v4929_v48  ;;  %v4293_v43 = vmul.f32 %v4287_v3, %v5400_v21  ;;  %v4932_v14 = vld [vmem:[%s6010_s2 + $0xc0] sm:$0xff]  ;;  %v4458_v29 = vmul.f32 %v4456_v37, %v5432_v46 }
 0x728   :  { %4301 = vmatpush1.msra.mxu0 %v4291_v38  ;;  %4364 = vmatprep.mubr.f32.mxu0 %v5066_v2 }
 0x729   :  { %4371 = vmatprep.subr.mxu1 %v4294_v63  ;;  %v4451_v39 = vpop.permute.xlu1 %4450  ;;  %v4616_v41 = vpop.permute.xlu0 %4615 }
 0x72a   :  { %v4455_v15 = vsel %vm1319_vm7, %v4449_v5, %v4451_v39 }
 0x72b   :  { %v4459_v40 = vmul.f32 %v4455_v15, %v5415_v32  ;;  %4931 = vmatmul.mubr.msk.f32.vlgmr.msra.gmra.mrb[4].mxu1 %vm105_vm2, %v4929_v48 }
 0x72c   :  { %4372 = vmatpush1.msra.mxu1 %v4293_v43  ;;  %4435 = vmatprep.mubr.f32.mxu1 %v5066_v2 }
 0x72d   :  { %4467 = vmatprep.subr.mxu0 %v4459_v40  ;;  %v4453_v21 = vpop.permute.xlu1 %4452  ;;  %v4614_v6 = vpop.permute.xlu0 %4613 }
 0x72e   :  { %v4457_v8 = vsel %vm1319_vm7, %v4453_v21, %v4447_v31  ;;  %v4454_v52 = vsel %vm1319_vm7, %v4451_v39, %v4453_v21  ;;  %v4623_v11 = vsel %vm1510_vm8, %v4614_v6, %v4616_v41 }
 0x72f   :  { %v4461_v32 = vmul.f32 %v4457_v8, %v5429_v45  ;;  %4933 = vmatmul.mubr.msk.f32.vlgmr.msra.gmra.mrb[4].mxu0 %vm105_vm2, %v4932_v14  ;;  %v4460_v57 = vmul.f32 %v4454_v52, %v5435_v47  ;;  %v4935_v45 = vld [vmem:[%s6010_s2 + $0xc8] sm:$0xff]  ;;  %v4625_v47 = vmul.f32 %v4623_v11, %v5467_v23  ;;  %v4938_v23 = vld [vmem:[%s6010_s2 + $0xd0] sm:$0xff] }
 0x730   :  { %4468 = vmatpush1.msra.mxu0 %v4458_v29  ;;  %4531 = vmatprep.mubr.f32.mxu0 %v5066_v2 }
 0x731   :  { %4538 = vmatprep.subr.mxu1 %v4461_v32  ;;  %v4618_v50 = vpop.permute.xlu1 %4617 }
 0x732   :  { %v4622_v46 = vsel %vm1510_vm8, %v4616_v41, %v4618_v50 }
 0x733   :  { %v4626_v12 = vmul.f32 %v4622_v46, %v5451_v59  ;;  %4934 = vmatmul.mubr.msk.f32.vlgmr.msra.gmra.mrb[4].mxu1 %vm105_vm2, %v4932_v14 }
 0x734   :  { %4539 = vmatpush1.msra.mxu1 %v4460_v57  ;;  %4602 = vmatprep.mubr.f32.mxu1 %v5066_v2 }
 0x735   :  { %4634 = vmatprep.subr.mxu0 %v4626_v12  ;;  %v4620_v30 = vpop.permute.xlu1 %4619 }
 0x736   :  { %v4624_v36 = vsel %vm1510_vm8, %v4620_v30, %v4614_v6  ;;  %v4621_v10 = vsel %vm1510_vm8, %v4618_v50, %v4620_v30 }
 0x737   :  { %v4628_v59 = vmul.f32 %v4624_v36, %v5464_v22  ;;  %4936 = vmatmul.mubr.msk.f32.vlgmr.msra.gmra.mrb[4].mxu0 %vm105_vm2, %v4935_v45  ;;  %v4627_v55 = vmul.f32 %v4621_v10, %v5470_v24 }
 0x738   :  { %4635 = vmatpush1.msra.mxu0 %v4625_v47  ;;  %4698 = vmatprep.mubr.f32.mxu0 %v5066_v2 }
 0x739   :  { %4705 = vmatprep.subr.mxu1 %v4628_v59 }
 0x73b   :  { %4937 = vmatmul.mubr.msk.f32.vlgmr.msra.gmra.mrb[4].mxu1 %vm105_vm2, %v4935_v45 }
 0x73c   :  { %4706 = vmatpush1.msra.mxu1 %v4627_v55  ;;  %4769 = vmatprep.mubr.f32.mxu1 %v5066_v2 }
 0x73e   :  { %v4785_v9 = vpop.permute.xlu0 %4784 }
 0x73f   :  { %4939 = vmatmul.mubr.msk.f32.vlgmr.msra.gmra.mrb[4].mxu0 %vm105_vm2, %v4938_v23 }
 0x743   :  { %4940 = vmatmul.mubr.msk.f32.vlgmr.msra.gmra.mrb[4].mxu1 %vm105_vm2, %v4938_v23 }
 0x812   :  { %v4700_v22 = vpop.f32.mrb[4].mxu0 }
 0x813   :  { %v4787_v58 = vadd.f32 %v4785_v9, %v4700_v22  ;;  %v4702_v26 = vpop.f32.mrb[5].mxu0 }
 0x814   :  { %v4788_v34 = vadd.f32 %v4785_v9, %v4702_v26 }
 0x815   :  { %v4791_v18 = vmul.f32 0.01, %v4787_v58 }
 0x816   :  { %v4792_v24 = vmul.f32 0.01, %v4788_v34  ;;  %v4771_v20 = vpop.f32.mrb[4].mxu1 }
 0x817   :  { %v4795_v16 = vmax.f32 %v4787_v58, %v4791_v18  ;;  %v4789_v27 = vadd.f32 %v4785_v9, %v4771_v20  ;;  %v4773_v33 = vpop.f32.mrb[5].mxu1 }
 0x818   :  { %v4796_v62 = vmax.f32 %v4788_v34, %v4792_v24  ;;  %v4790_v35 = vadd.f32 %v4785_v9, %v4773_v33 }
 0x819   :  { %v4804_v25 = vmul.f32 %v4795_v16, %v4795_v16  ;;  %v4793_v28 = vmul.f32 0.01, %v4789_v27 }
 0x81a   :  { %v4799_v2 = vadd.f32 %v4796_v62, %v4795_v16  ;;  %v4805_v54 = vmul.f32 %v4796_v62, %v4796_v62  ;;  %v4794_v61 = vmul.f32 0.01, %v4790_v35 }
 0x81b   :  { %v4797_v0 = vmax.f32 %v4789_v27, %v4793_v28 }
 0x81c   :  { %v4798_v17 = vmax.f32 %v4790_v35, %v4794_v61  ;;  %v4808_v42 = vadd.f32 %v4805_v54, %v4804_v25 }
 0x81d   :  { %v4806_v19 = vmul.f32 %v4797_v0, %v4797_v0  ;;  %v4800_v7 = vadd.f32 %v4799_v2, %v4797_v0 }
 0x81e   :  { %v4807_v5 = vmul.f32 %v4798_v17, %v4798_v17 }
 0x81f   :  { %v4801_v56 = vadd.f32 %v4800_v7, %v4798_v17  ;;  %v4809_v44 = vadd.f32 %v4808_v42, %v4806_v19 }
 0x821   :  { %4802 = vadd.xlane.f32.xlu1 %v4801_v56  ;;  %v4810_v49 = vadd.f32 %v4809_v44, %v4807_v5 }
 0x823   :  { %4811 = vadd.xlane.f32.xlu0 %v4810_v49 }
 0x8ae   :  { %v4803_v4 = vpop.xlane.xlu1 %4802 }
 0x8af   :  { %v4813_v53 = vmul.f32 0.001953125, %v4803_v4 }
 0x8b0   :  { %v4812_v48 = vpop.xlane.xlu0 %4811 }
 0x8b1   :  { %v4815_v31 = vmul.f32 %v4813_v53, %v4813_v53  ;;  %v4814_v51 = vmul.f32 0.001953125, %v4812_v48 }
 0x8b3   :  { %v4816_v38 = vsub.f32 %v4814_v51, %v4815_v31 }
 0x8b5   :  { %v4817_v60 = vmax.f32 %v4816_v38, 0.0 }
 0x8b7   :  { %v4818_v3 = vadd.f32 1e-05, %v4817_v60 }
 0x8b9   :  { %5064 = vrsqrt.f32 %v4818_v3 }
 0x8c3   :  { %v5065_v63 = vpop.eup %5064 }
 0x8c4   :  { %v4820_v39 = vmul.f32 %v5065_v63, %v5826_v13 }
 0x8c6   :  { %4829 = vperm.xlu0 %5057, %v4820_v39   ;;  %v4821_v43 = vmul.f32 %v4820_v39, %v4813_v53 }
 0x8c8   :  { %4823 = vrot.lane.b32.xlu1 %v4821_v43, %s5070_s25 }
 0x8ca   :  { %5059 = vset.pattern.permute.xlu0 %v5077_v1 }
 0x93a   :  { %v4824_v41 = vpop.permute.xlu1 %4823 }
 0x93b   :  { %v4826_v15 = vsub.f32 %v5826_v13, %v4824_v41 }
 0x93d   :  { %4838 = vperm.xlu1 %5058, %v4826_v15  }
 0x945   :  { %v4830_v37 = vpop.permute.xlu0 %4829 }
 0x946   :  { %v4832_v40 = vmul.f32 %v4830_v37, %v4795_v16  ;;  %v4833_v14 = vmul.f32 %v4830_v37, %v4796_v62  ;;  %v4834_v21 = vmul.f32 %v4830_v37, %v4797_v0  ;;  %v4835_v29 = vmul.f32 %v4830_v37, %v4798_v17 }
 0x9bc   :  { %v4839_v8 = vpop.permute.xlu1 %4838 }
 0x9bd   :  { %v4841_v52 = vadd.f32 %v4839_v8, %v4832_v40  ;;  %v4842_v32 = vadd.f32 %v4839_v8, %v4833_v14  ;;  %v4843_v6 = vadd.f32 %v4839_v8, %v4834_v21  ;;  %v4844_v50 = vadd.f32 %v4839_v8, %v4835_v29 }
 0x9bf   :  { %4845 = vst [vmem:[%s6011_s4] sm:$0xff] %v4841_v52  ;;  %4846 = vst [vmem:[%s6011_s4 + $0x8] sm:$0xff] %v4842_v32 }
 0x9c0   :  { %4847 = vst [vmem:[%s6011_s4 + $0x10] sm:$0xff] %v4843_v6  ;;  %4848 = vst [vmem:[%s6011_s4 + $0x18] sm:$0xff] %v4844_v50 }

</bundles_post_ra>
